<compile_context>
chip_gen: v7x
topology: tpu7x:2x2x1
jax: 0.10.0
libtpu: 0.0.40
codegen_flags: <defaults>
</compile_context>

<pallas_src>
import functools
import math

import jax
import jax.numpy as jnp
from jax.experimental import pallas as pl
from jax.experimental.pallas import tpu as pltpu


# ----------------------------- model config ---------------------------------
S = 8          # sequence length
B = 2          # batch
D = 32         # model dim
H = 4          # attention heads
DH = D // H    # head dim
F = 64         # feed-forward dim
L = 2          # num encoder layers
EPS = 1e-5
VPACK_LANES = 128   # all bias/LN vectors fit in one 128-lane vreg row


def _dot_nt(a, b):
    """a [m,k] @ b[n,k]^T -> [m,n] without an explicit transpose op."""
    return jax.lax.dot_general(a, b, (((1,), (1,)), ((), ())),
                               preferred_element_type=jnp.float32)


# ------------------------------ Pallas kernel --------------------------------
def _encoder_kernel(x_ref, mask_ref, wpack_ref, vpack_ref, out_ref, attn_ref,
                    *, num_layers, batch, seq, d_model, n_heads, d_head, d_ff):
    bs = batch * seq
    x = x_ref[...]                       # [B*S, D]  activation slab (stays resident)
    mask = mask_ref[...]                 # [B*S, B*S] additive (0 / -1e9), hoisted
    scale = 1.0 / math.sqrt(d_head)
    inv_h = 1.0 / n_heads

    for layer in range(num_layers):      # static unroll over layers (fused)
        # --- packed parameters, static slices (few lane-dense loads) ---
        wqkv = wpack_ref[layer, :, 0:3 * d_model]                              # [D, 3D]
        wo = wpack_ref[layer, :, 3 * d_model:4 * d_model]                      # [D, D]
        w1 = wpack_ref[layer, :, 4 * d_model:4 * d_model + d_ff]               # [D, F]
        w2t = wpack_ref[layer, :, 4 * d_model + d_ff:4 * d_model + 2 * d_ff]   # [D, F] = W2^T
        vec = vpack_ref[layer]                                                 # [8, 128] (1 vreg)
        bqkv = vec[0:1, 0:3 * d_model]
        bo = vec[1:2, 0:d_model]
        g1 = vec[2:3, 0:d_model]
        be1 = vec[3:4, 0:d_model]
        bf1 = vec[4:5, 0:d_ff]
        bf2 = vec[5:6, 0:d_model]
        g2 = vec[6:7, 0:d_model]
        be2 = vec[7:8, 0:d_model]

        # --- fused QKV projection on the whole batch slab (MXU) ---
        qkv = jnp.dot(x, wqkv, preferred_element_type=jnp.float32) + bqkv      # [BS, 3D]

        # --- multi-head attention over the slab; batch isolation via additive mask ---
        attn_sum = jnp.zeros((bs, bs), jnp.float32)
        head_outs = []
        for h in range(n_heads):          # static H=4 loop (see header note)
            c0 = h * d_head
            qh = qkv[:, c0:c0 + d_head] * scale
            kh = qkv[:, d_model + c0:d_model + c0 + d_head]
            vh = qkv[:, 2 * d_model + c0:2 * d_model + c0 + d_head]
            s = _dot_nt(qh, kh) + mask                                         # [BS, BS]
            s = s - jnp.max(s, axis=-1, keepdims=True)
            p = jnp.exp(s)
            p = p * pl.reciprocal(jnp.sum(p, axis=-1, keepdims=True), approx=True)
            attn_sum = attn_sum + p
            head_outs.append(jnp.dot(p, vh, preferred_element_type=jnp.float32))

        # head-averaged attention weights: per-batch diagonal blocks of p_avg
        p_avg = attn_sum * inv_h
        for b in range(batch):
            r = b * seq
            attn_ref[layer, b] = p_avg[r:r + seq, r:r + seq]

        ao = jnp.concatenate(head_outs, axis=-1)                               # [BS, D]
        ao = jnp.dot(ao, wo, preferred_element_type=jnp.float32) + bo

        # --- residual + LayerNorm 1 ---
        y = x + ao
        mu = jnp.mean(y, axis=-1, keepdims=True)
        var = jnp.mean(jnp.square(y - mu), axis=-1, keepdims=True)
        y = (y - mu) * jax.lax.rsqrt(var + EPS) * g1 + be1

        # --- feed-forward (second matmul contracts against packed W2^T) ---
        ff = jnp.dot(y, w1, preferred_element_type=jnp.float32) + bf1
        ff = jnp.maximum(ff, 0.0)
        ff = _dot_nt(ff, w2t) + bf2

        # --- residual + LayerNorm 2 ---
        z = y + ff
        mu2 = jnp.mean(z, axis=-1, keepdims=True)
        var2 = jnp.mean(jnp.square(z - mu2), axis=-1, keepdims=True)
        x = (z - mu2) * jax.lax.rsqrt(var2 + EPS) * g2 + be2

    out_ref[...] = x


# ------------------------------ public wrapper --------------------------------
def _pack_params(layer_params):
    """Pack per-layer params into 2 lane-dense arrays: [L,D,4D+2F] and [L,8,128]."""
    assert 3 * D <= VPACK_LANES and F <= VPACK_LANES
    wpack = jnp.stack(
        [jnp.concatenate([p["wqkv"], p["wo"], p["w1"], p["w2"].T], axis=1)
         for p in layer_params], axis=0)                       # [L, D, 3D+D+F+F]
    vrows = ["bqkv", "bo", "g1", "be1", "bf1", "bf2", "g2", "be2"]
    vblocks = []
    for p in layer_params:
        vp = jnp.zeros((8, VPACK_LANES), jnp.float32)
        for i, name in enumerate(vrows):
            row = p[name][0]
            vp = vp.at[i, :row.shape[0]].set(row)
        vblocks.append(vp)
    vpack = jnp.stack(vblocks, axis=0)                         # [L, 8, 128]
    return wpack, vpack


@jax.jit
def transformer_encoder_pallas(x_sbd, key_padding_mask, layer_params):
    """PyTorch-convention forward.

    x_sbd: [S, B, D], key_padding_mask: [B, S] bool (True = pad).
    Returns (output [S, B, D], weights [L, B, S, S]) or (output, None) if L == 0.
    """
    s, b, d = x_sbd.shape
    n_layers = len(layer_params)
    if n_layers == 0:
        return x_sbd, None

    wpack, vpack = _pack_params(layer_params)

    # additive mask on the [B*S, B*S] slab: forbid cross-batch pairs + padded keys
    batch_id = jnp.arange(b * s) // s
    key_ok = jnp.logical_not(key_padding_mask.reshape(b * s))
    valid = (batch_id[:, None] == batch_id[None, :]) & key_ok[None, :]
    mask_full = jnp.where(valid, 0.0, -1e9).astype(jnp.float32)      # [B*S, B*S]

    # single layout change for the whole fused encoder: [S,B,D] -> [B*S, D]
    x2d = jnp.transpose(x_sbd, (1, 0, 2)).reshape(b * s, d)

    kernel = functools.partial(
        _encoder_kernel, num_layers=n_layers, batch=b, seq=s,
        d_model=d, n_heads=H, d_head=DH, d_ff=F)
    vmem = pl.BlockSpec(memory_space=pltpu.MemorySpace.VMEM)
    out2d, attn = pl.pallas_call(
        kernel,
        out_shape=[jax.ShapeDtypeStruct((b * s, d), jnp.float32),
                   jax.ShapeDtypeStruct((n_layers, b, s, s), jnp.float32)],
        in_specs=[vmem, vmem, vmem, vmem],
        out_specs=[vmem, vmem],
    )(x2d, mask_full, wpack, vpack)

    out = jnp.transpose(out2d.reshape(b, s, d), (1, 0, 2))           # [S, B, D]
    return out, attn


# --------------------------- pure-JAX reference ------------------------------
def _encoder_layer_ref(x_bsd, addmask_b1s, p):
    qkv = x_bsd @ p["wqkv"] + p["bqkv"][0]
    q, k, v = jnp.split(qkv, 3, axis=-1)

    def heads(t):  # [B,S,D] -> [B,H,S,DH]
        return t.reshape(B, S, H, DH).transpose(0, 2, 1, 3)

    qh, kh, vh = heads(q), heads(k), heads(v)
    s = jnp.einsum("bhqd,bhkd->bhqk", qh, kh) / math.sqrt(DH)
    s = s + addmask_b1s[:, None, :, :]
    pattn = jax.nn.softmax(s, axis=-1)
    ao = jnp.einsum("bhqk,bhkd->bhqd", pattn, vh)
    ao = ao.transpose(0, 2, 1, 3).reshape(B, S, D)
    ao = ao @ p["wo"] + p["bo"][0]
    y = x_bsd + ao
    mu = y.mean(-1, keepdims=True); var = ((y - mu) ** 2).mean(-1, keepdims=True)
    y = (y - mu) / jnp.sqrt(var + EPS) * p["g1"][0] + p["be1"][0]
    ff = jnp.maximum(y @ p["w1"] + p["bf1"][0], 0.0) @ p["w2"] + p["bf2"][0]
    z = y + ff
    mu = z.mean(-1, keepdims=True); var = ((z - mu) ** 2).mean(-1, keepdims=True)
    z = (z - mu) / jnp.sqrt(var + EPS) * p["g2"][0] + p["be2"][0]
    return z, pattn.mean(axis=1)


def transformer_encoder_ref(x_sbd, key_padding_mask, layer_params):
    x = jnp.transpose(x_sbd, (1, 0, 2))
    addmask = jnp.where(key_padding_mask, -1e9, 0.0).astype(jnp.float32)[:, None, :]
    ws = []
    for p in layer_params:
        x, a = _encoder_layer_ref(x, addmask, p)
        ws.append(a)
    return jnp.transpose(x, (1, 0, 2)), jnp.stack(ws, 0)


# --------------------------------- main --------------------------------------
def _init_layer_params(key):
    ks = jax.random.split(key, 6)
    sc = 0.05
    return {
        "wqkv": sc * jax.random.normal(ks[0], (D, 3 * D), jnp.float32),
        "bqkv": jnp.zeros((1, 3 * D), jnp.float32),
        "wo":   sc * jax.random.normal(ks[1], (D, D), jnp.float32),
        "bo":   jnp.zeros((1, D), jnp.float32),
        "g1":   jnp.ones((1, D), jnp.float32),
        "be1":  jnp.zeros((1, D), jnp.float32),
        "w1":   sc * jax.random.normal(ks[2], (D, F), jnp.float32),
        "bf1":  0.01 * jax.random.normal(ks[3], (1, F), jnp.float32),
        "w2":   sc * jax.random.normal(ks[4], (F, D), jnp.float32),
        "bf2":  0.01 * jax.random.normal(ks[5], (1, D), jnp.float32),
        "g2":   jnp.ones((1, D), jnp.float32),
        "be2":  jnp.zeros((1, D), jnp.float32),
    }


if __name__ == "__main__":
    root = jax.random.PRNGKey(0)
    k_x, k_p = jax.random.split(root)

    # input follows PyTorch seq-first convention: [S, B, D]
    x = jax.random.normal(k_x, (S, B, D), jnp.float32)
    # key padding mask [B, S], True = ignore that key position
    key_padding_mask = jnp.zeros((B, S), dtype=bool)
    key_padding_mask = key_padding_mask.at[0, -2:].set(True)

    layer_params = [_init_layer_params(k) for k in jax.random.split(k_p, L)]

    out, weights = transformer_encoder_pallas(x, key_padding_mask, layer_params)
    out = jax.block_until_ready(out)
    weights = jax.block_until_ready(weights)

    ref_out, ref_w = transformer_encoder_ref(x, key_padding_mask, layer_params)
    assert out.shape == (S, B, D) and weights.shape == (L, B, S, S)
    # tolerances account for the approximate (EUP) reciprocal in the softmax
    assert jnp.allclose(out, ref_out, rtol=2e-3, atol=2e-3)
    assert jnp.allclose(weights, ref_w, rtol=2e-3, atol=2e-3)

    print("KERNEL_OK")
</pallas_src>

<mosaic_0001>
module attributes {stable_mosaic.version = 11 : i64} {
  func.func @_encoder_kernel(%arg0: memref<16x32xf32, #tpu.memory_space<vmem>>, %arg1: memref<16x16xf32, #tpu.memory_space<vmem>>, %arg2: memref<2x32x256xf32, #tpu.memory_space<vmem>>, %arg3: memref<2x8x128xf32, #tpu.memory_space<vmem>>, %arg4: memref<16x32xf32, #tpu.memory_space<vmem>>, %arg5: memref<2x2x8x8xf32, #tpu.memory_space<vmem>>) attributes {dimension_semantics = [], scalar_prefetch = 0 : i64, scratch_operands = 0 : i64, tpu.core_type = #tpu.core_type<tc>} {
    %c0 = arith.constant 0 : index
    %c0_0 = arith.constant 0 : index
    %0 = vector.load %arg0[%c0, %c0_0] : memref<16x32xf32, #tpu.memory_space<vmem>>, vector<16x32xf32>
    %c0_1 = arith.constant 0 : index
    %c0_2 = arith.constant 0 : index
    %1 = vector.load %arg1[%c0_1, %c0_2] : memref<16x16xf32, #tpu.memory_space<vmem>>, vector<16x16xf32>
    %c0_3 = arith.constant 0 : index
    %c0_4 = arith.constant 0 : index
    %c0_5 = arith.constant 0 : index
    %2 = vector.load %arg2[%c0_3, %c0_4, %c0_5] : memref<2x32x256xf32, #tpu.memory_space<vmem>>, vector<1x32x96xf32>
    %3 = vector.shape_cast %2 : vector<1x32x96xf32> to vector<32x96xf32>
    %c0_6 = arith.constant 0 : index
    %c0_7 = arith.constant 0 : index
    %c96 = arith.constant 96 : index
    %4 = vector.load %arg2[%c0_6, %c0_7, %c96] : memref<2x32x256xf32, #tpu.memory_space<vmem>>, vector<1x32x32xf32>
    %5 = vector.shape_cast %4 : vector<1x32x32xf32> to vector<32x32xf32>
    %c0_8 = arith.constant 0 : index
    %c0_9 = arith.constant 0 : index
    %c128 = arith.constant 128 : index
    %6 = vector.load %arg2[%c0_8, %c0_9, %c128] : memref<2x32x256xf32, #tpu.memory_space<vmem>>, vector<1x32x64xf32>
    %7 = vector.shape_cast %6 : vector<1x32x64xf32> to vector<32x64xf32>
    %c0_10 = arith.constant 0 : index
    %c0_11 = arith.constant 0 : index
    %c192 = arith.constant 192 : index
    %8 = vector.load %arg2[%c0_10, %c0_11, %c192] : memref<2x32x256xf32, #tpu.memory_space<vmem>>, vector<1x32x64xf32>
    %9 = vector.shape_cast %8 : vector<1x32x64xf32> to vector<32x64xf32>
    %c0_12 = arith.constant 0 : index
    %c0_13 = arith.constant 0 : index
    %c0_14 = arith.constant 0 : index
    %10 = vector.load %arg3[%c0_12, %c0_13, %c0_14] : memref<2x8x128xf32, #tpu.memory_space<vmem>>, vector<1x8x128xf32>
    %11 = vector.shape_cast %10 : vector<1x8x128xf32> to vector<8x128xf32>
    %12 = vector.extract_strided_slice %11 {offsets = [0, 0], sizes = [1, 96], strides = [1, 1]} : vector<8x128xf32> to vector<1x96xf32>
    %13 = vector.extract_strided_slice %11 {offsets = [1, 0], sizes = [1, 32], strides = [1, 1]} : vector<8x128xf32> to vector<1x32xf32>
    %14 = vector.extract_strided_slice %11 {offsets = [2, 0], sizes = [1, 32], strides = [1, 1]} : vector<8x128xf32> to vector<1x32xf32>
    %15 = vector.extract_strided_slice %11 {offsets = [3, 0], sizes = [1, 32], strides = [1, 1]} : vector<8x128xf32> to vector<1x32xf32>
    %16 = vector.extract_strided_slice %11 {offsets = [4, 0], sizes = [1, 64], strides = [1, 1]} : vector<8x128xf32> to vector<1x64xf32>
    %17 = vector.extract_strided_slice %11 {offsets = [5, 0], sizes = [1, 32], strides = [1, 1]} : vector<8x128xf32> to vector<1x32xf32>
    %18 = vector.extract_strided_slice %11 {offsets = [6, 0], sizes = [1, 32], strides = [1, 1]} : vector<8x128xf32> to vector<1x32xf32>
    %19 = vector.extract_strided_slice %11 {offsets = [7, 0], sizes = [1, 32], strides = [1, 1]} : vector<8x128xf32> to vector<1x32xf32>
    %cst = arith.constant dense<0.000000e+00> : vector<16x96xf32>
    %20 = tpu.matmul %0, %3, %cst {dimension_numbers = #tpu.dot_dimension_numbers<[1], [0], [0], [1], [0, 0, 1, 1], [], []>} : vector<16x32xf32>, vector<32x96xf32>, vector<16x96xf32> -> vector<16x96xf32>
    %21 = vector.broadcast %12 : vector<1x96xf32> to vector<16x96xf32>
    %22 = arith.addf %20, %21 : vector<16x96xf32>
    %cst_15 = arith.constant 0.000000e+00 : f32
    %23 = vector.broadcast %cst_15 : f32 to vector<16x16xf32>
    %24 = vector.extract_strided_slice %22 {offsets = [0, 0], sizes = [16, 8], strides = [1, 1]} : vector<16x96xf32> to vector<16x8xf32>
    %cst_16 = arith.constant 0.353553385 : f32
    %25 = vector.broadcast %cst_16 : f32 to vector<16x8xf32>
    %26 = arith.mulf %24, %25 : vector<16x8xf32>
    %27 = vector.extract_strided_slice %22 {offsets = [0, 32], sizes = [16, 8], strides = [1, 1]} : vector<16x96xf32> to vector<16x8xf32>
    %28 = vector.extract_strided_slice %22 {offsets = [0, 64], sizes = [16, 8], strides = [1, 1]} : vector<16x96xf32> to vector<16x8xf32>
    %cst_17 = arith.constant dense<0.000000e+00> : vector<16x16xf32>
    %29 = tpu.matmul %26, %27, %cst_17 {dimension_numbers = #tpu.dot_dimension_numbers<[1], [1], [0], [0], [0, 0, 1, 0], [], []>} : vector<16x8xf32>, vector<16x8xf32>, vector<16x16xf32> -> vector<16x16xf32>
    %30 = arith.addf %29, %1 : vector<16x16xf32>
    %cst_18 = arith.constant dense<0xFF800000> : vector<16xf32>
    %31 = vector.multi_reduction <maximumf>, %30, %cst_18 [1] : vector<16x16xf32> to vector<16xf32>
    %32 = vector.shape_cast %31 : vector<16xf32> to vector<16x1xf32>
    %33 = vector.broadcast %32 : vector<16x1xf32> to vector<16x16xf32>
    %34 = arith.subf %30, %33 : vector<16x16xf32>
    %35 = math.exp %34 : vector<16x16xf32>
    %cst_19 = arith.constant dense<0.000000e+00> : vector<16xf32>
    %36 = vector.multi_reduction <add>, %35, %cst_19 [1] : vector<16x16xf32> to vector<16xf32>
    %37 = vector.shape_cast %36 : vector<16xf32> to vector<16x1xf32>
    %38 = tpu.reciprocal %37 {approx = true} : vector<16x1xf32> -> vector<16x1xf32>
    %39 = vector.broadcast %38 : vector<16x1xf32> to vector<16x16xf32>
    %40 = arith.mulf %35, %39 : vector<16x16xf32>
    %41 = arith.addf %23, %40 : vector<16x16xf32>
    %cst_20 = arith.constant dense<0.000000e+00> : vector<16x8xf32>
    %42 = tpu.matmul %40, %28, %cst_20 {dimension_numbers = #tpu.dot_dimension_numbers<[1], [0], [0], [1], [0, 0, 1, 1], [], []>} : vector<16x16xf32>, vector<16x8xf32>, vector<16x8xf32> -> vector<16x8xf32>
    %43 = vector.extract_strided_slice %22 {offsets = [0, 8], sizes = [16, 8], strides = [1, 1]} : vector<16x96xf32> to vector<16x8xf32>
    %cst_21 = arith.constant 0.353553385 : f32
    %44 = vector.broadcast %cst_21 : f32 to vector<16x8xf32>
    %45 = arith.mulf %43, %44 : vector<16x8xf32>
    %46 = vector.extract_strided_slice %22 {offsets = [0, 40], sizes = [16, 8], strides = [1, 1]} : vector<16x96xf32> to vector<16x8xf32>
    %47 = vector.extract_strided_slice %22 {offsets = [0, 72], sizes = [16, 8], strides = [1, 1]} : vector<16x96xf32> to vector<16x8xf32>
    %cst_22 = arith.constant dense<0.000000e+00> : vector<16x16xf32>
    %48 = tpu.matmul %45, %46, %cst_22 {dimension_numbers = #tpu.dot_dimension_numbers<[1], [1], [0], [0], [0, 0, 1, 0], [], []>} : vector<16x8xf32>, vector<16x8xf32>, vector<16x16xf32> -> vector<16x16xf32>
    %49 = arith.addf %48, %1 : vector<16x16xf32>
    %cst_23 = arith.constant dense<0xFF800000> : vector<16xf32>
    %50 = vector.multi_reduction <maximumf>, %49, %cst_23 [1] : vector<16x16xf32> to vector<16xf32>
    %51 = vector.shape_cast %50 : vector<16xf32> to vector<16x1xf32>
    %52 = vector.broadcast %51 : vector<16x1xf32> to vector<16x16xf32>
    %53 = arith.subf %49, %52 : vector<16x16xf32>
    %54 = math.exp %53 : vector<16x16xf32>
    %cst_24 = arith.constant dense<0.000000e+00> : vector<16xf32>
    %55 = vector.multi_reduction <add>, %54, %cst_24 [1] : vector<16x16xf32> to vector<16xf32>
    %56 = vector.shape_cast %55 : vector<16xf32> to vector<16x1xf32>
    %57 = tpu.reciprocal %56 {approx = true} : vector<16x1xf32> -> vector<16x1xf32>
    %58 = vector.broadcast %57 : vector<16x1xf32> to vector<16x16xf32>
    %59 = arith.mulf %54, %58 : vector<16x16xf32>
    %60 = arith.addf %41, %59 : vector<16x16xf32>
    %cst_25 = arith.constant dense<0.000000e+00> : vector<16x8xf32>
    %61 = tpu.matmul %59, %47, %cst_25 {dimension_numbers = #tpu.dot_dimension_numbers<[1], [0], [0], [1], [0, 0, 1, 1], [], []>} : vector<16x16xf32>, vector<16x8xf32>, vector<16x8xf32> -> vector<16x8xf32>
    %62 = vector.extract_strided_slice %22 {offsets = [0, 16], sizes = [16, 8], strides = [1, 1]} : vector<16x96xf32> to vector<16x8xf32>
    %cst_26 = arith.constant 0.353553385 : f32
    %63 = vector.broadcast %cst_26 : f32 to vector<16x8xf32>
    %64 = arith.mulf %62, %63 : vector<16x8xf32>
    %65 = vector.extract_strided_slice %22 {offsets = [0, 48], sizes = [16, 8], strides = [1, 1]} : vector<16x96xf32> to vector<16x8xf32>
    %66 = vector.extract_strided_slice %22 {offsets = [0, 80], sizes = [16, 8], strides = [1, 1]} : vector<16x96xf32> to vector<16x8xf32>
    %cst_27 = arith.constant dense<0.000000e+00> : vector<16x16xf32>
    %67 = tpu.matmul %64, %65, %cst_27 {dimension_numbers = #tpu.dot_dimension_numbers<[1], [1], [0], [0], [0, 0, 1, 0], [], []>} : vector<16x8xf32>, vector<16x8xf32>, vector<16x16xf32> -> vector<16x16xf32>
    %68 = arith.addf %67, %1 : vector<16x16xf32>
    %cst_28 = arith.constant dense<0xFF800000> : vector<16xf32>
    %69 = vector.multi_reduction <maximumf>, %68, %cst_28 [1] : vector<16x16xf32> to vector<16xf32>
    %70 = vector.shape_cast %69 : vector<16xf32> to vector<16x1xf32>
    %71 = vector.broadcast %70 : vector<16x1xf32> to vector<16x16xf32>
    %72 = arith.subf %68, %71 : vector<16x16xf32>
    %73 = math.exp %72 : vector<16x16xf32>
    %cst_29 = arith.constant dense<0.000000e+00> : vector<16xf32>
    %74 = vector.multi_reduction <add>, %73, %cst_29 [1] : vector<16x16xf32> to vector<16xf32>
    %75 = vector.shape_cast %74 : vector<16xf32> to vector<16x1xf32>
    %76 = tpu.reciprocal %75 {approx = true} : vector<16x1xf32> -> vector<16x1xf32>
    %77 = vector.broadcast %76 : vector<16x1xf32> to vector<16x16xf32>
    %78 = arith.mulf %73, %77 : vector<16x16xf32>
    %79 = arith.addf %60, %78 : vector<16x16xf32>
    %cst_30 = arith.constant dense<0.000000e+00> : vector<16x8xf32>
    %80 = tpu.matmul %78, %66, %cst_30 {dimension_numbers = #tpu.dot_dimension_numbers<[1], [0], [0], [1], [0, 0, 1, 1], [], []>} : vector<16x16xf32>, vector<16x8xf32>, vector<16x8xf32> -> vector<16x8xf32>
    %81 = vector.extract_strided_slice %22 {offsets = [0, 24], sizes = [16, 8], strides = [1, 1]} : vector<16x96xf32> to vector<16x8xf32>
    %cst_31 = arith.constant 0.353553385 : f32
    %82 = vector.broadcast %cst_31 : f32 to vector<16x8xf32>
    %83 = arith.mulf %81, %82 : vector<16x8xf32>
    %84 = vector.extract_strided_slice %22 {offsets = [0, 56], sizes = [16, 8], strides = [1, 1]} : vector<16x96xf32> to vector<16x8xf32>
    %85 = vector.extract_strided_slice %22 {offsets = [0, 88], sizes = [16, 8], strides = [1, 1]} : vector<16x96xf32> to vector<16x8xf32>
    %cst_32 = arith.constant dense<0.000000e+00> : vector<16x16xf32>
    %86 = tpu.matmul %83, %84, %cst_32 {dimension_numbers = #tpu.dot_dimension_numbers<[1], [1], [0], [0], [0, 0, 1, 0], [], []>} : vector<16x8xf32>, vector<16x8xf32>, vector<16x16xf32> -> vector<16x16xf32>
    %87 = arith.addf %86, %1 : vector<16x16xf32>
    %cst_33 = arith.constant dense<0xFF800000> : vector<16xf32>
    %88 = vector.multi_reduction <maximumf>, %87, %cst_33 [1] : vector<16x16xf32> to vector<16xf32>
    %89 = vector.shape_cast %88 : vector<16xf32> to vector<16x1xf32>
    %90 = vector.broadcast %89 : vector<16x1xf32> to vector<16x16xf32>
    %91 = arith.subf %87, %90 : vector<16x16xf32>
    %92 = math.exp %91 : vector<16x16xf32>
    %cst_34 = arith.constant dense<0.000000e+00> : vector<16xf32>
    %93 = vector.multi_reduction <add>, %92, %cst_34 [1] : vector<16x16xf32> to vector<16xf32>
    %94 = vector.shape_cast %93 : vector<16xf32> to vector<16x1xf32>
    %95 = tpu.reciprocal %94 {approx = true} : vector<16x1xf32> -> vector<16x1xf32>
    %96 = vector.broadcast %95 : vector<16x1xf32> to vector<16x16xf32>
    %97 = arith.mulf %92, %96 : vector<16x16xf32>
    %98 = arith.addf %79, %97 : vector<16x16xf32>
    %cst_35 = arith.constant dense<0.000000e+00> : vector<16x8xf32>
    %99 = tpu.matmul %97, %85, %cst_35 {dimension_numbers = #tpu.dot_dimension_numbers<[1], [0], [0], [1], [0, 0, 1, 1], [], []>} : vector<16x16xf32>, vector<16x8xf32>, vector<16x8xf32> -> vector<16x8xf32>
    %cst_36 = arith.constant 2.500000e-01 : f32
    %100 = vector.broadcast %cst_36 : f32 to vector<16x16xf32>
    %101 = arith.mulf %98, %100 : vector<16x16xf32>
    %102 = vector.extract_strided_slice %101 {offsets = [0, 0], sizes = [8, 8], strides = [1, 1]} : vector<16x16xf32> to vector<8x8xf32>
    %c0_37 = arith.constant 0 : index
    %c0_38 = arith.constant 0 : index
    %c0_39 = arith.constant 0 : index
    %c0_40 = arith.constant 0 : index
    %103 = vector.load %arg5[%c0_37, %c0_38, %c0_39, %c0_40] : memref<2x2x8x8xf32, #tpu.memory_space<vmem>>, vector<1x1x8x8xf32>
    %104 = vector.shape_cast %103 : vector<1x1x8x8xf32> to vector<8x8xf32>
    %105 = vector.shape_cast %102 : vector<8x8xf32> to vector<1x1x8x8xf32>
    tpu.vector_store %arg5[%c0_37, %c0_38, %c0_39, %c0_40], %105 {strides = array<i32>} : memref<2x2x8x8xf32, #tpu.memory_space<vmem>>, vector<1x1x8x8xf32>,
    %106 = vector.extract_strided_slice %101 {offsets = [8, 8], sizes = [8, 8], strides = [1, 1]} : vector<16x16xf32> to vector<8x8xf32>
    %c0_41 = arith.constant 0 : index
    %c1 = arith.constant 1 : index
    %c0_42 = arith.constant 0 : index
    %c0_43 = arith.constant 0 : index
    %107 = vector.load %arg5[%c0_41, %c1, %c0_42, %c0_43] : memref<2x2x8x8xf32, #tpu.memory_space<vmem>>, vector<1x1x8x8xf32>
    %108 = vector.shape_cast %107 : vector<1x1x8x8xf32> to vector<8x8xf32>
    %109 = vector.shape_cast %106 : vector<8x8xf32> to vector<1x1x8x8xf32>
    tpu.vector_store %arg5[%c0_41, %c1, %c0_42, %c0_43], %109 {strides = array<i32>} : memref<2x2x8x8xf32, #tpu.memory_space<vmem>>, vector<1x1x8x8xf32>,
    %110 = tpu.concatenate %42, %61, %80, %99 in 1 : vector<16x8xf32>, vector<16x8xf32>, vector<16x8xf32>, vector<16x8xf32> -> vector<16x32xf32>
    %cst_44 = arith.constant dense<0.000000e+00> : vector<16x32xf32>
    %111 = tpu.matmul %110, %5, %cst_44 {dimension_numbers = #tpu.dot_dimension_numbers<[1], [0], [0], [1], [0, 0, 1, 1], [], []>} : vector<16x32xf32>, vector<32x32xf32>, vector<16x32xf32> -> vector<16x32xf32>
    %112 = vector.broadcast %13 : vector<1x32xf32> to vector<16x32xf32>
    %113 = arith.addf %111, %112 : vector<16x32xf32>
    %114 = arith.addf %0, %113 : vector<16x32xf32>
    %cst_45 = arith.constant dense<0.000000e+00> : vector<16xf32>
    %115 = vector.multi_reduction <add>, %114, %cst_45 [1] : vector<16x32xf32> to vector<16xf32>
    %116 = vector.shape_cast %115 : vector<16xf32> to vector<16x1xf32>
    %cst_46 = arith.constant 3.200000e+01 : f32
    %117 = vector.broadcast %cst_46 : f32 to vector<16x1xf32>
    %118 = arith.divf %116, %117 : vector<16x1xf32>
    %119 = vector.broadcast %118 : vector<16x1xf32> to vector<16x32xf32>
    %120 = arith.subf %114, %119 : vector<16x32xf32>
    %121 = arith.mulf %120, %120 : vector<16x32xf32>
    %cst_47 = arith.constant dense<0.000000e+00> : vector<16xf32>
    %122 = vector.multi_reduction <add>, %121, %cst_47 [1] : vector<16x32xf32> to vector<16xf32>
    %123 = vector.shape_cast %122 : vector<16xf32> to vector<16x1xf32>
    %cst_48 = arith.constant 3.200000e+01 : f32
    %124 = vector.broadcast %cst_48 : f32 to vector<16x1xf32>
    %125 = arith.divf %123, %124 : vector<16x1xf32>
    %126 = vector.broadcast %118 : vector<16x1xf32> to vector<16x32xf32>
    %127 = arith.subf %114, %126 : vector<16x32xf32>
    %cst_49 = arith.constant 9.99999974E-6 : f32
    %128 = vector.broadcast %cst_49 : f32 to vector<16x1xf32>
    %129 = arith.addf %125, %128 : vector<16x1xf32>
    %130 = math.rsqrt %129 : vector<16x1xf32>
    %131 = vector.broadcast %130 : vector<16x1xf32> to vector<16x32xf32>
    %132 = arith.mulf %127, %131 : vector<16x32xf32>
    %133 = vector.broadcast %14 : vector<1x32xf32> to vector<16x32xf32>
    %134 = arith.mulf %132, %133 : vector<16x32xf32>
    %135 = vector.broadcast %15 : vector<1x32xf32> to vector<16x32xf32>
    %136 = arith.addf %134, %135 : vector<16x32xf32>
    %cst_50 = arith.constant dense<0.000000e+00> : vector<16x64xf32>
    %137 = tpu.matmul %136, %7, %cst_50 {dimension_numbers = #tpu.dot_dimension_numbers<[1], [0], [0], [1], [0, 0, 1, 1], [], []>} : vector<16x32xf32>, vector<32x64xf32>, vector<16x64xf32> -> vector<16x64xf32>
    %138 = vector.broadcast %16 : vector<1x64xf32> to vector<16x64xf32>
    %139 = arith.addf %137, %138 : vector<16x64xf32>
    %cst_51 = arith.constant 0.000000e+00 : f32
    %140 = vector.broadcast %cst_51 : f32 to vector<16x64xf32>
    %141 = arith.maximumf %139, %140 : vector<16x64xf32>
    %cst_52 = arith.constant dense<0.000000e+00> : vector<16x32xf32>
    %142 = tpu.matmul %141, %9, %cst_52 {dimension_numbers = #tpu.dot_dimension_numbers<[1], [1], [0], [0], [0, 0, 1, 0], [], []>} : vector<16x64xf32>, vector<32x64xf32>, vector<16x32xf32> -> vector<16x32xf32>
    %143 = vector.broadcast %17 : vector<1x32xf32> to vector<16x32xf32>
    %144 = arith.addf %142, %143 : vector<16x32xf32>
    %145 = arith.addf %136, %144 : vector<16x32xf32>
    %cst_53 = arith.constant dense<0.000000e+00> : vector<16xf32>
    %146 = vector.multi_reduction <add>, %145, %cst_53 [1] : vector<16x32xf32> to vector<16xf32>
    %147 = vector.shape_cast %146 : vector<16xf32> to vector<16x1xf32>
    %cst_54 = arith.constant 3.200000e+01 : f32
    %148 = vector.broadcast %cst_54 : f32 to vector<16x1xf32>
    %149 = arith.divf %147, %148 : vector<16x1xf32>
    %150 = vector.broadcast %149 : vector<16x1xf32> to vector<16x32xf32>
    %151 = arith.subf %145, %150 : vector<16x32xf32>
    %152 = arith.mulf %151, %151 : vector<16x32xf32>
    %cst_55 = arith.constant dense<0.000000e+00> : vector<16xf32>
    %153 = vector.multi_reduction <add>, %152, %cst_55 [1] : vector<16x32xf32> to vector<16xf32>
    %154 = vector.shape_cast %153 : vector<16xf32> to vector<16x1xf32>
    %cst_56 = arith.constant 3.200000e+01 : f32
    %155 = vector.broadcast %cst_56 : f32 to vector<16x1xf32>
    %156 = arith.divf %154, %155 : vector<16x1xf32>
    %157 = vector.broadcast %149 : vector<16x1xf32> to vector<16x32xf32>
    %158 = arith.subf %145, %157 : vector<16x32xf32>
    %cst_57 = arith.constant 9.99999974E-6 : f32
    %159 = vector.broadcast %cst_57 : f32 to vector<16x1xf32>
    %160 = arith.addf %156, %159 : vector<16x1xf32>
    %161 = math.rsqrt %160 : vector<16x1xf32>
    %162 = vector.broadcast %161 : vector<16x1xf32> to vector<16x32xf32>
    %163 = arith.mulf %158, %162 : vector<16x32xf32>
    %164 = vector.broadcast %18 : vector<1x32xf32> to vector<16x32xf32>
    %165 = arith.mulf %163, %164 : vector<16x32xf32>
    %166 = vector.broadcast %19 : vector<1x32xf32> to vector<16x32xf32>
    %167 = arith.addf %165, %166 : vector<16x32xf32>
    %c1_58 = arith.constant 1 : index
    %c0_59 = arith.constant 0 : index
    %c0_60 = arith.constant 0 : index
    %168 = vector.load %arg2[%c1_58, %c0_59, %c0_60] : memref<2x32x256xf32, #tpu.memory_space<vmem>>, vector<1x32x96xf32>
    %169 = vector.shape_cast %168 : vector<1x32x96xf32> to vector<32x96xf32>
    %c1_61 = arith.constant 1 : index
    %c0_62 = arith.constant 0 : index
    %c96_63 = arith.constant 96 : index
    %170 = vector.load %arg2[%c1_61, %c0_62, %c96_63] : memref<2x32x256xf32, #tpu.memory_space<vmem>>, vector<1x32x32xf32>
    %171 = vector.shape_cast %170 : vector<1x32x32xf32> to vector<32x32xf32>
    %c1_64 = arith.constant 1 : index
    %c0_65 = arith.constant 0 : index
    %c128_66 = arith.constant 128 : index
    %172 = vector.load %arg2[%c1_64, %c0_65, %c128_66] : memref<2x32x256xf32, #tpu.memory_space<vmem>>, vector<1x32x64xf32>
    %173 = vector.shape_cast %172 : vector<1x32x64xf32> to vector<32x64xf32>
    %c1_67 = arith.constant 1 : index
    %c0_68 = arith.constant 0 : index
    %c192_69 = arith.constant 192 : index
    %174 = vector.load %arg2[%c1_67, %c0_68, %c192_69] : memref<2x32x256xf32, #tpu.memory_space<vmem>>, vector<1x32x64xf32>
    %175 = vector.shape_cast %174 : vector<1x32x64xf32> to vector<32x64xf32>
    %c1_70 = arith.constant 1 : index
    %c0_71 = arith.constant 0 : index
    %c0_72 = arith.constant 0 : index
    %176 = vector.load %arg3[%c1_70, %c0_71, %c0_72] : memref<2x8x128xf32, #tpu.memory_space<vmem>>, vector<1x8x128xf32>
    %177 = vector.shape_cast %176 : vector<1x8x128xf32> to vector<8x128xf32>
    %178 = vector.extract_strided_slice %177 {offsets = [0, 0], sizes = [1, 96], strides = [1, 1]} : vector<8x128xf32> to vector<1x96xf32>
    %179 = vector.extract_strided_slice %177 {offsets = [1, 0], sizes = [1, 32], strides = [1, 1]} : vector<8x128xf32> to vector<1x32xf32>
    %180 = vector.extract_strided_slice %177 {offsets = [2, 0], sizes = [1, 32], strides = [1, 1]} : vector<8x128xf32> to vector<1x32xf32>
    %181 = vector.extract_strided_slice %177 {offsets = [3, 0], sizes = [1, 32], strides = [1, 1]} : vector<8x128xf32> to vector<1x32xf32>
    %182 = vector.extract_strided_slice %177 {offsets = [4, 0], sizes = [1, 64], strides = [1, 1]} : vector<8x128xf32> to vector<1x64xf32>
    %183 = vector.extract_strided_slice %177 {offsets = [5, 0], sizes = [1, 32], strides = [1, 1]} : vector<8x128xf32> to vector<1x32xf32>
    %184 = vector.extract_strided_slice %177 {offsets = [6, 0], sizes = [1, 32], strides = [1, 1]} : vector<8x128xf32> to vector<1x32xf32>
    %185 = vector.extract_strided_slice %177 {offsets = [7, 0], sizes = [1, 32], strides = [1, 1]} : vector<8x128xf32> to vector<1x32xf32>
    %cst_73 = arith.constant dense<0.000000e+00> : vector<16x96xf32>
    %186 = tpu.matmul %167, %169, %cst_73 {dimension_numbers = #tpu.dot_dimension_numbers<[1], [0], [0], [1], [0, 0, 1, 1], [], []>} : vector<16x32xf32>, vector<32x96xf32>, vector<16x96xf32> -> vector<16x96xf32>
    %187 = vector.broadcast %178 : vector<1x96xf32> to vector<16x96xf32>
    %188 = arith.addf %186, %187 : vector<16x96xf32>
    %cst_74 = arith.constant 0.000000e+00 : f32
    %189 = vector.broadcast %cst_74 : f32 to vector<16x16xf32>
    %190 = vector.extract_strided_slice %188 {offsets = [0, 0], sizes = [16, 8], strides = [1, 1]} : vector<16x96xf32> to vector<16x8xf32>
    %cst_75 = arith.constant 0.353553385 : f32
    %191 = vector.broadcast %cst_75 : f32 to vector<16x8xf32>
    %192 = arith.mulf %190, %191 : vector<16x8xf32>
    %193 = vector.extract_strided_slice %188 {offsets = [0, 32], sizes = [16, 8], strides = [1, 1]} : vector<16x96xf32> to vector<16x8xf32>
    %194 = vector.extract_strided_slice %188 {offsets = [0, 64], sizes = [16, 8], strides = [1, 1]} : vector<16x96xf32> to vector<16x8xf32>
    %cst_76 = arith.constant dense<0.000000e+00> : vector<16x16xf32>
    %195 = tpu.matmul %192, %193, %cst_76 {dimension_numbers = #tpu.dot_dimension_numbers<[1], [1], [0], [0], [0, 0, 1, 0], [], []>} : vector<16x8xf32>, vector<16x8xf32>, vector<16x16xf32> -> vector<16x16xf32>
    %196 = arith.addf %195, %1 : vector<16x16xf32>
    %cst_77 = arith.constant dense<0xFF800000> : vector<16xf32>
    %197 = vector.multi_reduction <maximumf>, %196, %cst_77 [1] : vector<16x16xf32> to vector<16xf32>
    %198 = vector.shape_cast %197 : vector<16xf32> to vector<16x1xf32>
    %199 = vector.broadcast %198 : vector<16x1xf32> to vector<16x16xf32>
    %200 = arith.subf %196, %199 : vector<16x16xf32>
    %201 = math.exp %200 : vector<16x16xf32>
    %cst_78 = arith.constant dense<0.000000e+00> : vector<16xf32>
    %202 = vector.multi_reduction <add>, %201, %cst_78 [1] : vector<16x16xf32> to vector<16xf32>
    %203 = vector.shape_cast %202 : vector<16xf32> to vector<16x1xf32>
    %204 = tpu.reciprocal %203 {approx = true} : vector<16x1xf32> -> vector<16x1xf32>
    %205 = vector.broadcast %204 : vector<16x1xf32> to vector<16x16xf32>
    %206 = arith.mulf %201, %205 : vector<16x16xf32>
    %207 = arith.addf %189, %206 : vector<16x16xf32>
    %cst_79 = arith.constant dense<0.000000e+00> : vector<16x8xf32>
    %208 = tpu.matmul %206, %194, %cst_79 {dimension_numbers = #tpu.dot_dimension_numbers<[1], [0], [0], [1], [0, 0, 1, 1], [], []>} : vector<16x16xf32>, vector<16x8xf32>, vector<16x8xf32> -> vector<16x8xf32>
    %209 = vector.extract_strided_slice %188 {offsets = [0, 8], sizes = [16, 8], strides = [1, 1]} : vector<16x96xf32> to vector<16x8xf32>
    %cst_80 = arith.constant 0.353553385 : f32
    %210 = vector.broadcast %cst_80 : f32 to vector<16x8xf32>
    %211 = arith.mulf %209, %210 : vector<16x8xf32>
    %212 = vector.extract_strided_slice %188 {offsets = [0, 40], sizes = [16, 8], strides = [1, 1]} : vector<16x96xf32> to vector<16x8xf32>
    %213 = vector.extract_strided_slice %188 {offsets = [0, 72], sizes = [16, 8], strides = [1, 1]} : vector<16x96xf32> to vector<16x8xf32>
    %cst_81 = arith.constant dense<0.000000e+00> : vector<16x16xf32>
    %214 = tpu.matmul %211, %212, %cst_81 {dimension_numbers = #tpu.dot_dimension_numbers<[1], [1], [0], [0], [0, 0, 1, 0], [], []>} : vector<16x8xf32>, vector<16x8xf32>, vector<16x16xf32> -> vector<16x16xf32>
    %215 = arith.addf %214, %1 : vector<16x16xf32>
    %cst_82 = arith.constant dense<0xFF800000> : vector<16xf32>
    %216 = vector.multi_reduction <maximumf>, %215, %cst_82 [1] : vector<16x16xf32> to vector<16xf32>
    %217 = vector.shape_cast %216 : vector<16xf32> to vector<16x1xf32>
    %218 = vector.broadcast %217 : vector<16x1xf32> to vector<16x16xf32>
    %219 = arith.subf %215, %218 : vector<16x16xf32>
    %220 = math.exp %219 : vector<16x16xf32>
    %cst_83 = arith.constant dense<0.000000e+00> : vector<16xf32>
    %221 = vector.multi_reduction <add>, %220, %cst_83 [1] : vector<16x16xf32> to vector<16xf32>
    %222 = vector.shape_cast %221 : vector<16xf32> to vector<16x1xf32>
    %223 = tpu.reciprocal %222 {approx = true} : vector<16x1xf32> -> vector<16x1xf32>
    %224 = vector.broadcast %223 : vector<16x1xf32> to vector<16x16xf32>
    %225 = arith.mulf %220, %224 : vector<16x16xf32>
    %226 = arith.addf %207, %225 : vector<16x16xf32>
    %cst_84 = arith.constant dense<0.000000e+00> : vector<16x8xf32>
    %227 = tpu.matmul %225, %213, %cst_84 {dimension_numbers = #tpu.dot_dimension_numbers<[1], [0], [0], [1], [0, 0, 1, 1], [], []>} : vector<16x16xf32>, vector<16x8xf32>, vector<16x8xf32> -> vector<16x8xf32>
    %228 = vector.extract_strided_slice %188 {offsets = [0, 16], sizes = [16, 8], strides = [1, 1]} : vector<16x96xf32> to vector<16x8xf32>
    %cst_85 = arith.constant 0.353553385 : f32
    %229 = vector.broadcast %cst_85 : f32 to vector<16x8xf32>
    %230 = arith.mulf %228, %229 : vector<16x8xf32>
    %231 = vector.extract_strided_slice %188 {offsets = [0, 48], sizes = [16, 8], strides = [1, 1]} : vector<16x96xf32> to vector<16x8xf32>
    %232 = vector.extract_strided_slice %188 {offsets = [0, 80], sizes = [16, 8], strides = [1, 1]} : vector<16x96xf32> to vector<16x8xf32>
    %cst_86 = arith.constant dense<0.000000e+00> : vector<16x16xf32>
    %233 = tpu.matmul %230, %231, %cst_86 {dimension_numbers = #tpu.dot_dimension_numbers<[1], [1], [0], [0], [0, 0, 1, 0], [], []>} : vector<16x8xf32>, vector<16x8xf32>, vector<16x16xf32> -> vector<16x16xf32>
    %234 = arith.addf %233, %1 : vector<16x16xf32>
    %cst_87 = arith.constant dense<0xFF800000> : vector<16xf32>
    %235 = vector.multi_reduction <maximumf>, %234, %cst_87 [1] : vector<16x16xf32> to vector<16xf32>
    %236 = vector.shape_cast %235 : vector<16xf32> to vector<16x1xf32>
    %237 = vector.broadcast %236 : vector<16x1xf32> to vector<16x16xf32>
    %238 = arith.subf %234, %237 : vector<16x16xf32>
    %239 = math.exp %238 : vector<16x16xf32>
    %cst_88 = arith.constant dense<0.000000e+00> : vector<16xf32>
    %240 = vector.multi_reduction <add>, %239, %cst_88 [1] : vector<16x16xf32> to vector<16xf32>
    %241 = vector.shape_cast %240 : vector<16xf32> to vector<16x1xf32>
    %242 = tpu.reciprocal %241 {approx = true} : vector<16x1xf32> -> vector<16x1xf32>
    %243 = vector.broadcast %242 : vector<16x1xf32> to vector<16x16xf32>
    %244 = arith.mulf %239, %243 : vector<16x16xf32>
    %245 = arith.addf %226, %244 : vector<16x16xf32>
    %cst_89 = arith.constant dense<0.000000e+00> : vector<16x8xf32>
    %246 = tpu.matmul %244, %232, %cst_89 {dimension_numbers = #tpu.dot_dimension_numbers<[1], [0], [0], [1], [0, 0, 1, 1], [], []>} : vector<16x16xf32>, vector<16x8xf32>, vector<16x8xf32> -> vector<16x8xf32>
    %247 = vector.extract_strided_slice %188 {offsets = [0, 24], sizes = [16, 8], strides = [1, 1]} : vector<16x96xf32> to vector<16x8xf32>
    %cst_90 = arith.constant 0.353553385 : f32
    %248 = vector.broadcast %cst_90 : f32 to vector<16x8xf32>
    %249 = arith.mulf %247, %248 : vector<16x8xf32>
    %250 = vector.extract_strided_slice %188 {offsets = [0, 56], sizes = [16, 8], strides = [1, 1]} : vector<16x96xf32> to vector<16x8xf32>
    %251 = vector.extract_strided_slice %188 {offsets = [0, 88], sizes = [16, 8], strides = [1, 1]} : vector<16x96xf32> to vector<16x8xf32>
    %cst_91 = arith.constant dense<0.000000e+00> : vector<16x16xf32>
    %252 = tpu.matmul %249, %250, %cst_91 {dimension_numbers = #tpu.dot_dimension_numbers<[1], [1], [0], [0], [0, 0, 1, 0], [], []>} : vector<16x8xf32>, vector<16x8xf32>, vector<16x16xf32> -> vector<16x16xf32>
    %253 = arith.addf %252, %1 : vector<16x16xf32>
    %cst_92 = arith.constant dense<0xFF800000> : vector<16xf32>
    %254 = vector.multi_reduction <maximumf>, %253, %cst_92 [1] : vector<16x16xf32> to vector<16xf32>
    %255 = vector.shape_cast %254 : vector<16xf32> to vector<16x1xf32>
    %256 = vector.broadcast %255 : vector<16x1xf32> to vector<16x16xf32>
    %257 = arith.subf %253, %256 : vector<16x16xf32>
    %258 = math.exp %257 : vector<16x16xf32>
    %cst_93 = arith.constant dense<0.000000e+00> : vector<16xf32>
    %259 = vector.multi_reduction <add>, %258, %cst_93 [1] : vector<16x16xf32> to vector<16xf32>
    %260 = vector.shape_cast %259 : vector<16xf32> to vector<16x1xf32>
    %261 = tpu.reciprocal %260 {approx = true} : vector<16x1xf32> -> vector<16x1xf32>
    %262 = vector.broadcast %261 : vector<16x1xf32> to vector<16x16xf32>
    %263 = arith.mulf %258, %262 : vector<16x16xf32>
    %264 = arith.addf %245, %263 : vector<16x16xf32>
    %cst_94 = arith.constant dense<0.000000e+00> : vector<16x8xf32>
    %265 = tpu.matmul %263, %251, %cst_94 {dimension_numbers = #tpu.dot_dimension_numbers<[1], [0], [0], [1], [0, 0, 1, 1], [], []>} : vector<16x16xf32>, vector<16x8xf32>, vector<16x8xf32> -> vector<16x8xf32>
    %cst_95 = arith.constant 2.500000e-01 : f32
    %266 = vector.broadcast %cst_95 : f32 to vector<16x16xf32>
    %267 = arith.mulf %264, %266 : vector<16x16xf32>
    %268 = vector.extract_strided_slice %267 {offsets = [0, 0], sizes = [8, 8], strides = [1, 1]} : vector<16x16xf32> to vector<8x8xf32>
    %c1_96 = arith.constant 1 : index
    %c0_97 = arith.constant 0 : index
    %c0_98 = arith.constant 0 : index
    %c0_99 = arith.constant 0 : index
    %269 = vector.load %arg5[%c1_96, %c0_97, %c0_98, %c0_99] : memref<2x2x8x8xf32, #tpu.memory_space<vmem>>, vector<1x1x8x8xf32>
    %270 = vector.shape_cast %269 : vector<1x1x8x8xf32> to vector<8x8xf32>
    %271 = vector.shape_cast %268 : vector<8x8xf32> to vector<1x1x8x8xf32>
    tpu.vector_store %arg5[%c1_96, %c0_97, %c0_98, %c0_99], %271 {strides = array<i32>} : memref<2x2x8x8xf32, #tpu.memory_space<vmem>>, vector<1x1x8x8xf32>,
    %272 = vector.extract_strided_slice %267 {offsets = [8, 8], sizes = [8, 8], strides = [1, 1]} : vector<16x16xf32> to vector<8x8xf32>
    %c1_100 = arith.constant 1 : index
    %c1_101 = arith.constant 1 : index
    %c0_102 = arith.constant 0 : index
    %c0_103 = arith.constant 0 : index
    %273 = vector.load %arg5[%c1_100, %c1_101, %c0_102, %c0_103] : memref<2x2x8x8xf32, #tpu.memory_space<vmem>>, vector<1x1x8x8xf32>
    %274 = vector.shape_cast %273 : vector<1x1x8x8xf32> to vector<8x8xf32>
    %275 = vector.shape_cast %272 : vector<8x8xf32> to vector<1x1x8x8xf32>
    tpu.vector_store %arg5[%c1_100, %c1_101, %c0_102, %c0_103], %275 {strides = array<i32>} : memref<2x2x8x8xf32, #tpu.memory_space<vmem>>, vector<1x1x8x8xf32>,
    %276 = tpu.concatenate %208, %227, %246, %265 in 1 : vector<16x8xf32>, vector<16x8xf32>, vector<16x8xf32>, vector<16x8xf32> -> vector<16x32xf32>
    %cst_104 = arith.constant dense<0.000000e+00> : vector<16x32xf32>
    %277 = tpu.matmul %276, %171, %cst_104 {dimension_numbers = #tpu.dot_dimension_numbers<[1], [0], [0], [1], [0, 0, 1, 1], [], []>} : vector<16x32xf32>, vector<32x32xf32>, vector<16x32xf32> -> vector<16x32xf32>
    %278 = vector.broadcast %179 : vector<1x32xf32> to vector<16x32xf32>
    %279 = arith.addf %277, %278 : vector<16x32xf32>
    %280 = arith.addf %167, %279 : vector<16x32xf32>
    %cst_105 = arith.constant dense<0.000000e+00> : vector<16xf32>
    %281 = vector.multi_reduction <add>, %280, %cst_105 [1] : vector<16x32xf32> to vector<16xf32>
    %282 = vector.shape_cast %281 : vector<16xf32> to vector<16x1xf32>
    %cst_106 = arith.constant 3.200000e+01 : f32
    %283 = vector.broadcast %cst_106 : f32 to vector<16x1xf32>
    %284 = arith.divf %282, %283 : vector<16x1xf32>
    %285 = vector.broadcast %284 : vector<16x1xf32> to vector<16x32xf32>
    %286 = arith.subf %280, %285 : vector<16x32xf32>
    %287 = arith.mulf %286, %286 : vector<16x32xf32>
    %cst_107 = arith.constant dense<0.000000e+00> : vector<16xf32>
    %288 = vector.multi_reduction <add>, %287, %cst_107 [1] : vector<16x32xf32> to vector<16xf32>
    %289 = vector.shape_cast %288 : vector<16xf32> to vector<16x1xf32>
    %cst_108 = arith.constant 3.200000e+01 : f32
    %290 = vector.broadcast %cst_108 : f32 to vector<16x1xf32>
    %291 = arith.divf %289, %290 : vector<16x1xf32>
    %292 = vector.broadcast %284 : vector<16x1xf32> to vector<16x32xf32>
    %293 = arith.subf %280, %292 : vector<16x32xf32>
    %cst_109 = arith.constant 9.99999974E-6 : f32
    %294 = vector.broadcast %cst_109 : f32 to vector<16x1xf32>
    %295 = arith.addf %291, %294 : vector<16x1xf32>
    %296 = math.rsqrt %295 : vector<16x1xf32>
    %297 = vector.broadcast %296 : vector<16x1xf32> to vector<16x32xf32>
    %298 = arith.mulf %293, %297 : vector<16x32xf32>
    %299 = vector.broadcast %180 : vector<1x32xf32> to vector<16x32xf32>
    %300 = arith.mulf %298, %299 : vector<16x32xf32>
    %301 = vector.broadcast %181 : vector<1x32xf32> to vector<16x32xf32>
    %302 = arith.addf %300, %301 : vector<16x32xf32>
    %cst_110 = arith.constant dense<0.000000e+00> : vector<16x64xf32>
    %303 = tpu.matmul %302, %173, %cst_110 {dimension_numbers = #tpu.dot_dimension_numbers<[1], [0], [0], [1], [0, 0, 1, 1], [], []>} : vector<16x32xf32>, vector<32x64xf32>, vector<16x64xf32> -> vector<16x64xf32>
    %304 = vector.broadcast %182 : vector<1x64xf32> to vector<16x64xf32>
    %305 = arith.addf %303, %304 : vector<16x64xf32>
    %cst_111 = arith.constant 0.000000e+00 : f32
    %306 = vector.broadcast %cst_111 : f32 to vector<16x64xf32>
    %307 = arith.maximumf %305, %306 : vector<16x64xf32>
    %cst_112 = arith.constant dense<0.000000e+00> : vector<16x32xf32>
    %308 = tpu.matmul %307, %175, %cst_112 {dimension_numbers = #tpu.dot_dimension_numbers<[1], [1], [0], [0], [0, 0, 1, 0], [], []>} : vector<16x64xf32>, vector<32x64xf32>, vector<16x32xf32> -> vector<16x32xf32>
    %309 = vector.broadcast %183 : vector<1x32xf32> to vector<16x32xf32>
    %310 = arith.addf %308, %309 : vector<16x32xf32>
    %311 = arith.addf %302, %310 : vector<16x32xf32>
    %cst_113 = arith.constant dense<0.000000e+00> : vector<16xf32>
    %312 = vector.multi_reduction <add>, %311, %cst_113 [1] : vector<16x32xf32> to vector<16xf32>
    %313 = vector.shape_cast %312 : vector<16xf32> to vector<16x1xf32>
    %cst_114 = arith.constant 3.200000e+01 : f32
    %314 = vector.broadcast %cst_114 : f32 to vector<16x1xf32>
    %315 = arith.divf %313, %314 : vector<16x1xf32>
    %316 = vector.broadcast %315 : vector<16x1xf32> to vector<16x32xf32>
    %317 = arith.subf %311, %316 : vector<16x32xf32>
    %318 = arith.mulf %317, %317 : vector<16x32xf32>
    %cst_115 = arith.constant dense<0.000000e+00> : vector<16xf32>
    %319 = vector.multi_reduction <add>, %318, %cst_115 [1] : vector<16x32xf32> to vector<16xf32>
    %320 = vector.shape_cast %319 : vector<16xf32> to vector<16x1xf32>
    %cst_116 = arith.constant 3.200000e+01 : f32
    %321 = vector.broadcast %cst_116 : f32 to vector<16x1xf32>
    %322 = arith.divf %320, %321 : vector<16x1xf32>
    %323 = vector.broadcast %315 : vector<16x1xf32> to vector<16x32xf32>
    %324 = arith.subf %311, %323 : vector<16x32xf32>
    %cst_117 = arith.constant 9.99999974E-6 : f32
    %325 = vector.broadcast %cst_117 : f32 to vector<16x1xf32>
    %326 = arith.addf %322, %325 : vector<16x1xf32>
    %327 = math.rsqrt %326 : vector<16x1xf32>
    %328 = vector.broadcast %327 : vector<16x1xf32> to vector<16x32xf32>
    %329 = arith.mulf %324, %328 : vector<16x32xf32>
    %330 = vector.broadcast %184 : vector<1x32xf32> to vector<16x32xf32>
    %331 = arith.mulf %329, %330 : vector<16x32xf32>
    %332 = vector.broadcast %185 : vector<1x32xf32> to vector<16x32xf32>
    %333 = arith.addf %331, %332 : vector<16x32xf32>
    %c0_118 = arith.constant 0 : index
    %c0_119 = arith.constant 0 : index
    %334 = vector.load %arg4[%c0_118, %c0_119] : memref<16x32xf32, #tpu.memory_space<vmem>>, vector<16x32xf32>
    tpu.vector_store %arg4[%c0_118, %c0_119], %333 {strides = array<i32>} : memref<16x32xf32, #tpu.memory_space<vmem>>, vector<16x32xf32>,
    return
  }
}

</mosaic_0001>

<bundles_post_ra>
// kernel: transformer_encoder_pallas.1
= control target key start
LH: loop header
LB: loop body
LE: loop exit
PB: predicated region body
PF: predicated region fallthrough
CT: control target
= control target key end

     0   :  { %vm37_vm0 = vcmask 261120   ;;  %s4058_s0 = inlined_call_operand.vmem [shape: f32[16,32], index: 0, kind: input, shape index: {}]   ;;  %s4059_s1 = inlined_call_operand.vmem [shape: f32[16,16], index: 1, kind: input, shape index: {}]   ;;  %s4060_s2 = inlined_call_operand.vmem [shape: f32[2,32,256], index: 2, kind: input, shape index: {}]   ;;  %s4061_s3 = inlined_call_operand.vmem [shape: f32[2,8,128], index: 3, kind: input, shape index: {}]   ;;  %s4062_s4 = inlined_call_operand.vmem [shape: f32[16,32], index: 4, kind: output, shape index: {0}]   ;;  %s4063_s5 = inlined_call_operand.hbm [shape: f32[2,2,8,8], index: 5, kind: output, shape index: {1}]  }
   0x1   :  { %v3525_v0 = vld [vmem:[%s4060_s2] sm:$0xff]  ;;  %v3530_v1 = vld [vmem:[%s4060_s2 + $0x10] sm:$0xff] }
   0x2   :  { %v3535_v2 = vld [vmem:[%s4060_s2 + $0x20] sm:$0xff]  ;;  %v3289_v3 = vpack.i.bf16 %v3530_v1, %v3525_v0  ;;  %v3080_v4 = vpack.c.bf16 %v3530_v1, %v3525_v0  ;;  %v3544_v5 = vld [vmem:[%s4060_s2 + $0x30] sm:$0xff] }
   0x3   :  { %v3549_v6 = vld [vmem:[%s4058_s0] sm:$0xff]  ;;  %v3084_v7 = vpack.c.bf16 %v3544_v5, %v3535_v2 }
   0x4   :  { %2888 = vmatprep.mubr.msk.f32.mxu1 %vm37_vm0, %v3549_v6 }
   0x5   :  { %11 = vsyncpa [#allocation3], 0  ;;  %3081 = vmatprep.subr.bf16.mxu1 %v3080_v4  ;;  %v3558_v8 = vld [vmem:[%s4058_s0 + $0x8] sm:$0xff]  ;;  %v33_v9 = vlaneseq  ;;  %v3568_v12 = vld [vmem:[%s4061_s3] sm:$0xff]  ;;  %vm127_vm1 = vcmask 64512   ;;  %s3475_s0 = smov 96  }
   0x6   :  { %3083 = vmatpush3.bf16.msra.mxu1 %v3080_v4  ;;  %s3476_s7 = smov 120   ;;  %s3477_s8 = smov 88   ;;  %vm3591_vm2 = vmpackc.low %vm127_vm1, %vm127_vm1  ;;  %v3610_v32 = vld [vmem:[%s4059_s1 + $0x8] sm:$0xff]  ;;  %v3615_v33 = vld [vmem:[%s4059_s1] sm:$0xff]  ;;  %vm213_vm3 = vcmask 130048   ;;  %vm968_vm4 = vcmask 195584  }
   0x7   :  { %3085 = vmatprep.subr.bf16.mxu1 %v3084_v7  ;;  %v3562_v10 = vshrl.u32 %v33_v9, 7  ;;  %s3478_s13 = smov 64   ;;  %s3479_s14 = smov 80   ;;  %vm1216_vm5 = vcmask 523264  }
   0x8   :  { %s3480_s15 = smov 56   ;;  %s3481_s16 = smov 112   ;;  %vm3760_vm6 = vmpackc.low %vm1216_vm5, %vm1216_vm5 }
   0x9   :  { %v35_v11 = vsub.s32 0, %v3562_v10  ;;  %s3482_s17 = smov 72   ;;  %s3483_s18 = smov 104  }
   0xa   :  { %3087 = vmatpush3.bf16.msra.mxu1 %v3084_v7  ;;  %s3484_s19 = smov 48   ;;  %s3485_s20 = smov 32  }
   0xb   :  { %v36_v13 = vrot.slane %v3568_v12, %v35_v11  ;;  %s3486_s21 = smov 40   ;;  %s3487_s22 = smov 8  }
   0xc   :  { %s3488_s23 = smov 16   ;;  %s3489_s24 = smov 24  }
   0xd   :  { %2889 = vmatmul.mubr.msk.f32.vlgmr.msra.gmra.mrb[0].mxu1 %vm37_vm0, %v3558_v8 }
  0xe0   :  { %v2890_v14 = vpop.f32.mrb[0].mxu1 }
  0xe1   :  { %v116_v15 = vadd.f32 %v2890_v14, %v36_v13  ;;  %v110_v16 = vpop.f32.mrb[1].mxu1 }
  0xe2   :  { %v111_v17 = vadd.f32 %v110_v16, %v36_v13 }
  0xe3   :  { %v3583_v20 = vmul.f32 0.35355338, %v116_v15 }
  0xe4   :  { %v3573_v18 = vpack.i.bf16 %v116_v15, %v111_v17  ;;  %v3575_v19 = vmul.f32 0.35355338, %v111_v17 }
  0xe6   :  { %3250 = vrot.lane.b32.xlu0 %v3573_v18, %s3475_s0  ;;  %325 = vrot.lane.b32.xlu1 %v3575_v19, %s3476_s7 }
  0xe7   :  { %2895 = vmatprep.mubr.msk.f32.mxu1 %vm127_vm1, %v3575_v19 }
  0xea   :  { %3255 = vrot.lane.b32.xlu0 %v3573_v18, %s3477_s8  ;;  %327 = vrot.lane.b32.xlu1 %v3583_v20, %s3476_s7 }
 0x158   :  { %v3251_v21 = vpop.permute.xlu0 %3250  ;;  %v326_v30 = vpop.permute.xlu1 %325 }
 0x159   :  { %v3253_v22 = vunpack.i.h.bf16 %v3251_v21  ;;  %v3252_v23 = vunpack.i.l.bf16 %v3251_v21 }
 0x15b   :  { %v3088_v25 = vpack.c.bf16 %v3253_v22, %v3252_v23 }
 0x15c   :  { %v3256_v26 = vpop.permute.xlu0 %3255  ;;  %v328_v31 = vpop.permute.xlu1 %327 }
 0x15d   :  { %v3258_v27 = vunpack.i.h.bf16 %v3256_v26  ;;  %v3257_v28 = vunpack.i.l.bf16 %v3256_v26  ;;  %3090 = vmatprep.subr.msk.bf16.mxu1 %vm3591_vm2, %v3088_v25 }
 0x15e   :  { %3093 = vmatpush3.bf16.xpose.msk.msra.mxu1 %vm3591_vm2, %v3088_v25 }
 0x15f   :  { %v3098_v29 = vpack.c.bf16 %v3258_v27, %v3257_v28 }
 0x161   :  { %3100 = vmatprep.subr.msk.bf16.mxu1 %vm3591_vm2, %v3098_v29 }
 0x165   :  { %2896 = vmatmul.mubr.msk.f32.vlgmr.msra.gmra.mrb[2].mxu1 %vm127_vm1, %v3583_v20 }
 0x166   :  { %3103 = vmatpush3.bf16.xpose.msk.msra.mxu1 %vm3591_vm2, %v3098_v29  ;;  %2909 = vmatprep.mubr.msk.f32.mxu1 %vm127_vm1, %v326_v30 }
 0x16d   :  { %2910 = vmatmul.mubr.msk.f32.vlgmr.msra.gmra.mrb[4].mxu1 %vm127_vm1, %v328_v31 }
 0x238   :  { %v2897_v34 = vpop.f32.mrb[2].mxu1 }
 0x239   :  { %v210_v35 = vadd.f32 %v2897_v34, %v3610_v32  ;;  %v204_v36 = vpop.f32.mrb[3].mxu1 }
 0x23a   :  { %v205_v37 = vadd.f32 %v204_v36, %v3615_v33 }
 0x23b   :  { %v217_v38 = vsel %vm213_vm3, %v210_v35, -inf }
 0x23c   :  { %218 = vmax.xlane.f32.xlu1 %v217_v38  ;;  %v214_v39 = vsel %vm213_vm3, %v205_v37, -inf }
 0x23d   :  { %215 = vmax.xlane.f32.xlu0 %v214_v39 }
 0x240   :  { %v2911_v40 = vpop.f32.mrb[4].mxu1 }
 0x241   :  { %v407_v41 = vpop.f32.mrb[5].mxu1  ;;  %v413_v43 = vadd.f32 %v2911_v40, %v3610_v32 }
 0x242   :  { %v408_v42 = vadd.f32 %v407_v41, %v3615_v33 }
 0x243   :  { %v419_v45 = vsel %vm213_vm3, %v413_v43, -inf }
 0x244   :  { %v416_v44 = vsel %vm213_vm3, %v408_v42, -inf }
 0x245   :  { %417 = vmax.xlane.f32.xlu0 %v416_v44 }
 0x249   :  { %420 = vmax.xlane.f32.xlu0 %v419_v45 }
 0x24d   :  { %3260 = vrot.lane.b32.xlu1 %v3573_v18, %s3478_s13 }
 0x2c9   :  { %v219_v46 = vpop.xlane.xlu1 %218 }
 0x2ca   :  { %v221_v47 = vsub.f32 %v210_v35, %v219_v46  ;;  %v216_v48 = vpop.xlane.xlu0 %215 }
 0x2cb   :  { %v220_v49 = vsub.f32 %v205_v37, %v216_v48 }
 0x2cc   :  { %v224_v50 = vmul.f32 1.442695, %v221_v47 }
 0x2cd   :  { %v222_v51 = vmul.f32 1.442695, %v220_v49  ;;  %v3261_v52 = vpop.permute.xlu1 %3260 }
 0x2ce   :  { %3369 = vpow2.f32 %v224_v50  ;;  %v3263_v53 = vunpack.i.h.bf16 %v3261_v52  ;;  %v3262_v54 = vunpack.i.l.bf16 %v3261_v52 }
 0x2cf   :  { %3371 = vpow2.f32 %v222_v51 }
 0x2d0   :  { %v3094_v55 = vpack.c.bf16 %v3263_v53, %v3262_v54 }
 0x2d2   :  { %3095 = vmatprep.subr.bf16.mxu0 %v3094_v55  ;;  %v418_v56 = vpop.xlane.xlu0 %417 }
 0x2d3   :  { %3097 = vmatpush3.bf16.msra.mxu0 %v3094_v55  ;;  %v422_v9 = vsub.f32 %v408_v42, %v418_v56 }
 0x2d5   :  { %v424_v13 = vmul.f32 1.442695, %v422_v9 }
 0x2d6   :  { %v421_v57 = vpop.xlane.xlu0 %420 }
 0x2d7   :  { %v423_v58 = vsub.f32 %v413_v43, %v421_v57 }
 0x2d8   :  { %v3370_v59 = vpop.eup %3369 }
 0x2d9   :  { %v3372_v60 = vpop.eup %3371  ;;  %v426_v61 = vmul.f32 1.442695, %v423_v58  ;;  %v229_v62 = vsel %vm213_vm3, %v3370_v59, 0.0 }
 0x2da   :  { %230 = vadd.xlane.f32.xlu0 %v229_v62  ;;  %v226_v63 = vsel %vm213_vm3, %v3372_v60, 0.0 }
 0x2db   :  { %3373 = vpow2.f32 %v426_v61  ;;  %227 = vadd.xlane.f32.xlu1 %v226_v63 }
 0x2dc   :  { %3375 = vpow2.f32 %v424_v13 }
 0x2e5   :  { %v3374_v4 = vpop.eup %3373 }
 0x2e6   :  { %v431_v7 = vsel %vm213_vm3, %v3374_v4, 0.0  ;;  %v3376_v14 = vpop.eup %3375 }
 0x2e7   :  { %432 = vadd.xlane.f32.xlu0 %v431_v7  ;;  %v428_v15 = vsel %vm213_vm3, %v3376_v14, 0.0 }
 0x2ec   :  { %3270 = vrot.lane.b32.xlu1 %v3573_v18, %s3479_s14 }
 0x2fd   :  { %3265 = vrot.lane.b32.xlu0 %v3573_v18, %s3480_s15 }
 0x301   :  { %529 = vrot.lane.b32.xlu0 %v3583_v20, %s3481_s16 }
 0x310   :  { %429 = vadd.xlane.f32.xlu1 %v428_v15 }
 0x321   :  { %527 = vrot.lane.b32.xlu1 %v3575_v19, %s3481_s16 }
 0x367   :  { %v231_v16 = vpop.xlane.xlu0 %230 }
 0x368   :  { %3377 = vrcp.f32 %v231_v16  ;;  %v228_v17 = vpop.xlane.xlu1 %227 }
 0x369   :  { %3379 = vrcp.f32 %v228_v17 }
 0x36c   :  { %v3271_v27 = vpop.permute.xlu1 %3270 }
 0x36d   :  { %v3273_v29 = vunpack.i.h.bf16 %v3271_v27  ;;  %v3272_v30 = vunpack.i.l.bf16 %v3271_v27 }
 0x36f   :  { %v3108_v36 = vpack.c.bf16 %v3273_v29, %v3272_v30 }
 0x372   :  { %v3378_v21 = vpop.eup %3377 }
 0x373   :  { %v3380_v22 = vpop.eup %3379  ;;  %v235_v26 = vmul.f32 %v3378_v21, %v3370_v59 }
 0x374   :  { %v433_v23 = vpop.xlane.xlu0 %432  ;;  %v234_v25 = vmul.f32 %v3380_v22, %v3372_v60 }
 0x375   :  { %3381 = vrcp.f32 %v433_v23 }
 0x376   :  { %2902 = vmatprep.mubr.msk.f32.mxu0 %vm213_vm3, %v234_v25 }
 0x377   :  { %2903 = vmatmul.mubr.msk.f32.vlgmr.msra.gmra.mrb[0].mxu0 %vm213_vm3, %v235_v26 }
 0x378   :  { %v3266_v28 = vpop.permute.xlu0 %3265 }
 0x379   :  { %v3268_v31 = vunpack.i.h.bf16 %v3266_v28  ;;  %v3267_v34 = vunpack.i.l.bf16 %v3266_v28 }
 0x37b   :  { %v3104_v35 = vpack.c.bf16 %v3268_v31, %v3267_v34 }
 0x37c   :  { %v530_v45 = vpop.permute.xlu0 %529 }
 0x37d   :  { %3105 = vmatprep.subr.bf16.mxu0 %v3104_v35 }
 0x37e   :  { %3107 = vmatpush3.bf16.msra.mxu0 %v3104_v35 }
 0x37f   :  { %v3382_v37 = vpop.eup %3381  ;;  %3110 = vmatprep.subr.msk.bf16.mxu0 %vm3591_vm2, %v3108_v36 }
 0x380   :  { %v437_v38 = vmul.f32 %v3382_v37, %v3374_v4 }
 0x382   :  { %v3643_v39 = vadd.f32 %v437_v38, %v235_v26 }
 0x39d   :  { %v430_v40 = vpop.xlane.xlu1 %429 }
 0x39e   :  { %3383 = vrcp.f32 %v430_v40 }
 0x3a1   :  { %v528_v44 = vpop.permute.xlu1 %527 }
 0x3a8   :  { %v3384_v41 = vpop.eup %3383 }
 0x3a9   :  { %v436_v42 = vmul.f32 %v3384_v41, %v3376_v14 }
 0x3ab   :  { %v438_v43 = vadd.f32 %v436_v42, %v234_v25  ;;  %2916 = vmatprep.mubr.msk.f32.mxu0 %vm213_vm3, %v436_v42 }
 0x3ac   :  { %2917 = vmatmul.mubr.msk.f32.vlgmr.msra.gmra.mrb[2].mxu0 %vm213_vm3, %v437_v38 }
 0x3ad   :  { %3113 = vmatpush3.bf16.xpose.msk.msra.mxu0 %vm3591_vm2, %v3108_v36  ;;  %2923 = vmatprep.mubr.msk.f32.mxu0 %vm127_vm1, %v528_v44 }
 0x3b4   :  { %2924 = vmatmul.mubr.msk.f32.vlgmr.msra.gmra.mrb[4].mxu0 %vm127_vm1, %v530_v45 }
 0x44a   :  { %v3651_v46 = vpop.f32.mrb[0].mxu0 }
 0x44b   :  { %v3653_v47 = vpop.f32.mrb[1].mxu0 }
 0x47f   :  { %v3655_v48 = vpop.f32.mrb[2].mxu0 }
 0x480   :  { %v3657_v49 = vpop.f32.mrb[3].mxu0 }
 0x487   :  { %v2925_v50 = vpop.f32.mrb[4].mxu0 }
 0x488   :  { %v615_v51 = vadd.f32 %v2925_v50, %v3610_v32  ;;  %v609_v52 = vpop.f32.mrb[5].mxu0 }
 0x489   :  { %v610_v53 = vadd.f32 %v609_v52, %v3615_v33 }
 0x48a   :  { %v621_v54 = vsel %vm213_vm3, %v615_v51, -inf }
 0x48b   :  { %622 = vmax.xlane.f32.xlu0 %v621_v54  ;;  %v618_v55 = vsel %vm213_vm3, %v610_v53, -inf }
 0x48c   :  { %619 = vmax.xlane.f32.xlu1 %v618_v55 }
 0x518   :  { %v623_v56 = vpop.xlane.xlu0 %622 }
 0x519   :  { %v625_v57 = vsub.f32 %v615_v51, %v623_v56  ;;  %v620_v58 = vpop.xlane.xlu1 %619  ;;  %v3294_v56 = vpack.i.bf16 %v3544_v5, %v3535_v2 }
 0x51a   :  { %v624_v59 = vsub.f32 %v610_v53, %v620_v58 }
 0x51b   :  { %v628_v60 = vmul.f32 1.442695, %v625_v57 }
 0x51c   :  { %v626_v61 = vmul.f32 1.442695, %v624_v59 }
 0x51d   :  { %3385 = vpow2.f32 %v628_v60 }
 0x51e   :  { %3387 = vpow2.f32 %v626_v61 }
 0x527   :  { %v3386_v62 = vpop.eup %3385 }
 0x528   :  { %v3388_v63 = vpop.eup %3387  ;;  %v633_v4 = vsel %vm213_vm3, %v3386_v62, 0.0 }
 0x529   :  { %634 = vadd.xlane.f32.xlu1 %v633_v4  ;;  %v630_v7 = vsel %vm213_vm3, %v3388_v63, 0.0 }
 0x52a   :  { %631 = vadd.xlane.f32.xlu0 %v630_v7 }
 0x53a   :  { %3280 = vrot.lane.b32.xlu1 %v3573_v18, %s3482_s17 }
 0x53e   :  { %729 = vrot.lane.b32.xlu1 %v3575_v19, %s3483_s18 }
 0x540   :  { %3275 = vrot.lane.b32.xlu0 %v3573_v18, %s3484_s19 }
 0x544   :  { %731 = vrot.lane.b32.xlu0 %v3583_v20, %s3483_s18 }
 0x5b6   :  { %v635_v9 = vpop.xlane.xlu1 %634 }
 0x5b7   :  { %3389 = vrcp.f32 %v635_v9  ;;  %v632_v13 = vpop.xlane.xlu0 %631 }
 0x5b8   :  { %3391 = vrcp.f32 %v632_v13 }
 0x5ba   :  { %v3281_v14 = vpop.permute.xlu1 %3280 }
 0x5bb   :  { %v3276_v15 = vpop.permute.xlu0 %3275  ;;  %v3283_v16 = vunpack.i.h.bf16 %v3281_v14  ;;  %v3282_v17 = vunpack.i.l.bf16 %v3281_v14 }
 0x5bc   :  { %v3278_v21 = vunpack.i.h.bf16 %v3276_v15  ;;  %v3277_v22 = vunpack.i.l.bf16 %v3276_v15 }
 0x5bd   :  { %v3118_v25 = vpack.c.bf16 %v3283_v16, %v3282_v17 }
 0x5be   :  { %v3114_v23 = vpack.c.bf16 %v3278_v21, %v3277_v22  ;;  %v730_v30 = vpop.permute.xlu1 %729 }
 0x5bf   :  { %v732_v31 = vpop.permute.xlu0 %731 }
 0x5c0   :  { %3115 = vmatprep.subr.bf16.mxu1 %v3114_v23 }
 0x5c1   :  { %v3390_v19 = vpop.eup %3389  ;;  %3117 = vmatpush3.bf16.msra.mxu1 %v3114_v23 }
 0x5c2   :  { %v3392_v26 = vpop.eup %3391  ;;  %v639_v27 = vmul.f32 %v3390_v19, %v3386_v62  ;;  %3120 = vmatprep.subr.msk.bf16.mxu1 %vm3591_vm2, %v3118_v25 }
 0x5c3   :  { %v638_v20 = vmul.f32 %v3392_v26, %v3388_v63 }
 0x5c4   :  { %v3676_v28 = vadd.f32 %v639_v27, %v3643_v39 }
 0x5c5   :  { %v3678_v29 = vadd.f32 %v638_v20, %v438_v43  ;;  %2930 = vmatprep.mubr.msk.f32.mxu1 %vm213_vm3, %v638_v20 }
 0x5c6   :  { %2931 = vmatmul.mubr.msk.f32.vlgmr.msra.gmra.mrb[6].mxu1 %vm213_vm3, %v639_v27 }
 0x5c7   :  { %2937 = vmatprep.mubr.msk.f32.mxu1 %vm127_vm1, %v730_v30 }
 0x5ca   :  { %3123 = vmatpush3.bf16.xpose.msk.msra.mxu1 %vm3591_vm2, %v3118_v25 }
 0x5d1   :  { %2938 = vmatmul.mubr.msk.f32.vlgmr.msra.gmra.mrb[8].mxu1 %vm127_vm1, %v732_v31 }
 0x699   :  { %v2932_v34 = vpop.f32.mrb[6].mxu1 }
 0x69a   :  { %v720_v35 = vpop.f32.mrb[7].mxu1 }
 0x6a4   :  { %v2939_v36 = vpop.f32.mrb[8].mxu1 }
 0x6a5   :  { %v817_v37 = vadd.f32 %v2939_v36, %v3610_v32  ;;  %v811_v38 = vpop.f32.mrb[9].mxu1 }
 0x6a6   :  { %v812_v39 = vadd.f32 %v811_v38, %v3615_v33 }
 0x6a7   :  { %v823_v40 = vsel %vm213_vm3, %v817_v37, -inf }
 0x6a8   :  { %824 = vmax.xlane.f32.xlu0 %v823_v40  ;;  %v820_v41 = vsel %vm213_vm3, %v812_v39, -inf }
 0x6a9   :  { %821 = vmax.xlane.f32.xlu1 %v820_v41 }
 0x735   :  { %v825_v42 = vpop.xlane.xlu0 %824 }
 0x736   :  { %v827_v43 = vsub.f32 %v817_v37, %v825_v42  ;;  %v822_v44 = vpop.xlane.xlu1 %821 }
 0x737   :  { %v826_v45 = vsub.f32 %v812_v39, %v822_v44 }
 0x738   :  { %v830_v50 = vmul.f32 1.442695, %v827_v43 }
 0x739   :  { %v828_v51 = vmul.f32 1.442695, %v826_v45 }
 0x73a   :  { %3393 = vpow2.f32 %v830_v50 }
 0x73b   :  { %3395 = vpow2.f32 %v828_v51 }
 0x744   :  { %v3394_v52 = vpop.eup %3393 }
 0x745   :  { %v3396_v53 = vpop.eup %3395  ;;  %v835_v54 = vsel %vm213_vm3, %v3394_v52, 0.0 }
 0x746   :  { %836 = vadd.xlane.f32.xlu1 %v835_v54  ;;  %v832_v55 = vsel %vm213_vm3, %v3396_v53, 0.0 }
 0x747   :  { %833 = vadd.xlane.f32.xlu0 %v832_v55  ;;  %v29_v55 = vld [vmem:[%s4060_s2 + $0x18] sm:$0xff] }
 0x757   :  { %3290 = vrot.lane.b32.xlu1 %v3289_v3, %s3485_s20 }
 0x75b   :  { %3295 = vrot.lane.b32.xlu1 %v3294_v56, %s3485_s20 }
 0x75d   :  { %3285 = vrot.lane.b32.xlu0 %v3573_v18, %s3486_s21 }
 0x75f   :  { %944 = vrot.lane.b32.xlu1 %v3655_v48, %s3487_s22 }
 0x761   :  { %942 = vrot.lane.b32.xlu0 %v3657_v49, %s3487_s22 }
 0x763   :  { %952 = vrot.lane.b32.xlu1 %v2932_v34, %s3488_s23  ;;  %v973_v34 = vsub.s32 1, %v3562_v10 }
 0x765   :  { %950 = vrot.lane.b32.xlu0 %v720_v35, %s3488_s23 }
 0x7d3   :  { %v837_v0 = vpop.xlane.xlu1 %836 }
 0x7d4   :  { %3397 = vrcp.f32 %v837_v0  ;;  %v834_v1 = vpop.xlane.xlu0 %833  ;;  %v30_v0 = vld [vmem:[%s4060_s2 + $0x28] sm:$0xff] }
 0x7d5   :  { %3399 = vrcp.f32 %v834_v1  ;;  %v31_v1 = vld [vmem:[%s4060_s2 + $0x38] sm:$0xff] }
 0x7d7   :  { %v3291_v2 = vpop.permute.xlu1 %3290 }
 0x7d8   :  { %v3293_v3 = vunpack.i.h.bf16 %v3291_v2  ;;  %v3292_v5 = vunpack.i.l.bf16 %v3291_v2  ;;  %v3286_v18 = vpop.permute.xlu0 %3285  ;;  %v3140_v2 = vpack.c.bf16 %v31_v1, %v30_v0 }
 0x7d9   :  { %v3288_v57 = vunpack.i.h.bf16 %v3286_v18  ;;  %v3287_v58 = vunpack.i.l.bf16 %v3286_v18 }
 0x7da   :  { %v3128_v59 = vpack.c.bf16 %v3293_v3, %v3292_v5  ;;  %v3304_v5 = vpack.i.bf16 %v31_v1, %v30_v0 }
 0x7db   :  { %v3124_v48 = vpack.c.bf16 %v3288_v57, %v3287_v58  ;;  %v3296_v60 = vpop.permute.xlu1 %3295 }
 0x7dc   :  { %v3298_v61 = vunpack.i.h.bf16 %v3296_v60  ;;  %v3297_v49 = vunpack.i.l.bf16 %v3296_v60  ;;  %v943_v22 = vpop.permute.xlu0 %942 }
 0x7dd   :  { %3125 = vmatprep.subr.bf16.mxu0 %v3124_v48  ;;  %v964_v19 = vsel %vm127_vm1, %v3653_v47, %v943_v22  ;;  %v974_v47 = vrot.slane %v3568_v12, %v973_v34 }
 0x7de   :  { %v3398_v62 = vpop.eup %3397  ;;  %3127 = vmatpush3.bf16.msra.mxu0 %v3124_v48  ;;  %v3132_v9 = vpack.c.bf16 %v3298_v61, %v3297_v49  ;;  %v1103_v61 = vsub.s32 2, %v3562_v10  ;;  %v1109_v49 = vsub.s32 3, %v3562_v10 }
 0x7df   :  { %v3400_v63 = vpop.eup %3399  ;;  %v841_v4 = vmul.f32 %v3398_v62, %v3394_v52  ;;  %3129 = vmatprep.subr.bf16.mxu0 %v3128_v59  ;;  %v945_v21 = vpop.permute.xlu1 %944 }
 0x7e0   :  { %v840_v7 = vmul.f32 %v3400_v63, %v3396_v53  ;;  %v951_v25 = vpop.permute.xlu0 %950  ;;  %v965_v27 = vsel %vm127_vm1, %v3651_v46, %v945_v21  ;;  %v1104_v62 = vrot.slane %v3568_v12, %v1103_v61  ;;  %v1110_v21 = vrot.slane %v3568_v12, %v1109_v49 }
 0x7e1   :  { %v3708_v13 = vadd.f32 %v841_v4, %v3676_v28  ;;  %v966_v20 = vsel %vm213_vm3, %v964_v19, %v951_v25 }
 0x7e2   :  { %v842_v14 = vadd.f32 %v840_v7, %v3678_v29  ;;  %2944 = vmatprep.mubr.msk.f32.mxu0 %vm213_vm3, %v840_v7 }
 0x7e3   :  { %2945 = vmatmul.mubr.msk.f32.vlgmr.msra.gmra.mrb[6].mxu0 %vm213_vm3, %v841_v4  ;;  %v953_v23 = vpop.permute.xlu1 %952 }
 0x7e4   :  { %v931_v15 = vmul.f32 0.25, %v842_v14  ;;  %3131 = vmatpush3.bf16.msra.mxu0 %v3128_v59  ;;  %v967_v29 = vsel %vm213_vm3, %v965_v27, %v953_v23 }
 0x7e5   :  { %3133 = vmatprep.subr.bf16.mxu0 %v3132_v9 }
 0x7e6   :  { %933 = vst.msk [vmem:[#allocation2] sm:$0xff] %vm127_vm1, %v931_v15 }
 0x7e8   :  { %3135 = vmatpush3.bf16.msra.mxu0 %v3132_v9 }
 0x8b6   :  { %v2946_v16 = vpop.f32.mrb[6].mxu0 }
 0x8b7   :  { %960 = vrot.lane.b32.xlu1 %v2946_v16, %s3489_s24  ;;  %v922_v17 = vpop.f32.mrb[7].mxu0 }
 0x8b8   :  { %958 = vrot.lane.b32.xlu0 %v922_v17, %s3489_s24 }
 0x929   :  { %v961_v26 = vpop.permute.xlu1 %960 }
 0x92a   :  { %v959_v28 = vpop.permute.xlu0 %958  ;;  %v970_v31 = vsel %vm968_vm4, %v967_v29, %v961_v26 }
 0x92b   :  { %v969_v30 = vsel %vm968_vm4, %v966_v20, %v959_v28 }
 0x92c   :  { %2955 = vmatprep.mubr.msk.f32.mxu0 %vm37_vm0, %v969_v30  ;;  %v1115_v30 = vsub.s32 4, %v3562_v10 }
 0x92d   :  { %2956 = vmatmul.mubr.msk.f32.vlgmr.msra.gmra.mrb[8].mxu0 %vm37_vm0, %v970_v31 }
 0x92e   :  { %v1116_v31 = vrot.slane %v3568_v12, %v1115_v30 }
 0xa00   :  { %v2957_v46 = vpop.f32.mrb[8].mxu0 }
 0xa01   :  { %v1069_v35 = vadd.f32 %v2957_v46, %v974_v47  ;;  %v1063_v36 = vpop.f32.mrb[9].mxu0 }
 0xa02   :  { %v1064_v37 = vadd.f32 %v1063_v36, %v974_v47 }
 0xa03   :  { %v1073_v38 = vadd.f32 %v1069_v35, %v3558_v8 }
 0xa04   :  { %v1072_v39 = vadd.f32 %v1064_v37, %v3549_v6  ;;  %v28_v6 = vld [vmem:[%s4060_s2 + $0x8] sm:$0xff] }
 0xa05   :  { %v1077_v40 = vsel %vm37_vm0, %v1073_v38, 0.0  ;;  %v3136_v56 = vpack.c.bf16 %v29_v55, %v28_v6  ;;  %v3299_v3 = vpack.i.bf16 %v29_v55, %v28_v6 }
 0xa06   :  { %1078 = vadd.xlane.f32.xlu1 %v1077_v40  ;;  %v1074_v41 = vsel %vm37_vm0, %v1072_v39, 0.0 }
 0xa07   :  { %1075 = vadd.xlane.f32.xlu0 %v1074_v41  ;;  %3137 = vmatprep.subr.bf16.mxu1 %v3136_v56 }
 0xa08   :  { %3139 = vmatpush3.bf16.msra.mxu1 %v3136_v56 }
 0xa09   :  { %3141 = vmatprep.subr.bf16.mxu1 %v3140_v2 }
 0xa0c   :  { %3143 = vmatpush3.bf16.msra.mxu1 %v3140_v2 }
 0xa17   :  { %3300 = vrot.lane.b32.xlu1 %v3299_v3, %s3478_s13 }
 0xa93   :  { %v1079_v42 = vpop.xlane.xlu1 %1078 }
 0xa94   :  { %v1082_v43 = vmul.f32 0.03125, %v1079_v42  ;;  %v1076_v44 = vpop.xlane.xlu0 %1075 }
 0xa95   :  { %v1081_v45 = vmul.f32 0.03125, %v1076_v44 }
 0xa96   :  { %v1084_v50 = vsub.f32 %v1073_v38, %v1082_v43 }
 0xa97   :  { %v1083_v51 = vsub.f32 %v1072_v39, %v1081_v45  ;;  %v3301_v63 = vpop.permute.xlu1 %3300  ;;  %v1202_v39 = vsub.s32 5, %v3562_v10 }
 0xa98   :  { %v1086_v54 = vmul.f32 %v1084_v50, %v1084_v50  ;;  %v3303_v9 = vunpack.i.h.bf16 %v3301_v63  ;;  %v3302_v14 = vunpack.i.l.bf16 %v3301_v63 }
 0xa99   :  { %v1085_v52 = vmul.f32 %v1083_v51, %v1083_v51  ;;  %v1203_v40 = vrot.slane %v3568_v12, %v1202_v39 }
 0xa9a   :  { %v1090_v8 = vsel %vm37_vm0, %v1086_v54, 0.0  ;;  %v3144_v23 = vpack.c.bf16 %v3303_v9, %v3302_v14  ;;  %v1336_v14 = vsub.s32 6, %v3562_v10 }
 0xa9b   :  { %v1087_v53 = vsel %vm37_vm0, %v1085_v52, 0.0 }
 0xa9c   :  { %1088 = vadd.xlane.f32.xlu0 %v1087_v53  ;;  %3146 = vmatprep.subr.msk.bf16.mxu0 %vm3760_vm6, %v3144_v23 }
 0xa9d   :  { %3149 = vmatpush3.bf16.xpose.msk.msra.mxu0 %vm3760_vm6, %v3144_v23 }
 0xaa0   :  { %1091 = vadd.xlane.f32.xlu0 %v1090_v8 }
 0xab6   :  { %3305 = vrot.lane.b32.xlu0 %v3304_v5, %s3478_s13  ;;  %v3791_v5 = vld [vmem:[%s4060_s2 + $0x40] sm:$0xff] }
 0xb29   :  { %v1089_v18 = vpop.xlane.xlu0 %1088 }
 0xb2a   :  { %v1093_v57 = vmul.f32 0.03125, %v1089_v18  ;;  %v3796_v18 = vld [vmem:[%s4060_s2 + $0x50] sm:$0xff] }
 0xb2c   :  { %v1095_v58 = vadd.f32 1e-05, %v1093_v57  ;;  %v3156_v57 = vpack.c.bf16 %v3796_v18, %v3791_v5 }
 0xb2d   :  { %v1092_v59 = vpop.xlane.xlu0 %1091 }
 0xb2e   :  { %3401 = vrsqrt.f32 %v1095_v58  ;;  %v1094_v48 = vmul.f32 0.03125, %v1092_v59  ;;  %v3803_v58 = vld [vmem:[%s4060_s2 + $0x60] sm:$0xff]  ;;  %v3808_v59 = vld [vmem:[%s4060_s2 + $0x70] sm:$0xff]  ;;  %3157 = vmatprep.subr.bf16.mxu1 %v3156_v57 }
 0xb30   :  { %v1096_v60 = vadd.f32 1e-05, %v1094_v48  ;;  %v3160_v48 = vpack.c.bf16 %v3808_v59, %v3803_v58 }
 0xb31   :  { %v3306_v4 = vpop.permute.xlu0 %3305 }
 0xb32   :  { %3403 = vrsqrt.f32 %v1096_v60  ;;  %v3308_v15 = vunpack.i.h.bf16 %v3306_v4  ;;  %v3307_v16 = vunpack.i.l.bf16 %v3306_v4 }
 0xb34   :  { %v3150_v25 = vpack.c.bf16 %v3308_v15, %v3307_v16  ;;  %v1342_v15 = vsub.s32 7, %v3562_v10  ;;  %v1337_v16 = vrot.slane %v3568_v12, %v1336_v14 }
 0xb36   :  { %3152 = vmatprep.subr.msk.bf16.mxu0 %vm3760_vm6, %v3150_v25 }
 0xb37   :  { %3155 = vmatpush3.bf16.xpose.msk.msra.mxu0 %vm3760_vm6, %v3150_v25 }
 0xb38   :  { %v3402_v7 = vpop.eup %3401 }
 0xb39   :  { %v1099_v17 = vmul.f32 %v3402_v7, %v1083_v51 }
 0xb3b   :  { %v1105_v19 = vmul.f32 %v1104_v62, %v1099_v17 }
 0xb3c   :  { %v3404_v26 = vpop.eup %3403 }
 0xb3d   :  { %v1100_v27 = vmul.f32 %v3404_v26, %v1084_v50  ;;  %v1111_v20 = vadd.f32 %v1110_v21, %v1105_v19  ;;  %v1343_v19 = vrot.slane %v3568_v12, %v1342_v15 }
 0xb3f   :  { %v1106_v28 = vmul.f32 %v1104_v62, %v1100_v27  ;;  %2966 = vmatprep.mubr.msk.f32.mxu1 %vm37_vm0, %v1111_v20 }
 0xb41   :  { %v1112_v29 = vadd.f32 %v1110_v21, %v1106_v28 }
 0xb43   :  { %2967 = vmatmul.mubr.msk.f32.vlgmr.msra.gmra.mrb[10].mxu1 %vm37_vm0, %v1112_v29 }
 0xb44   :  { %3159 = vmatpush3.bf16.msra.mxu1 %v3156_v57 }
 0xb45   :  { %3161 = vmatprep.subr.bf16.mxu1 %v3160_v48 }
 0xb48   :  { %3163 = vmatpush3.bf16.msra.mxu1 %v3160_v48 }
 0xc16   :  { %v2968_v47 = vpop.f32.mrb[10].mxu1 }
 0xc17   :  { %v1195_v46 = vadd.f32 %v2968_v47, %v1116_v31  ;;  %v1189_v35 = vpop.f32.mrb[11].mxu1 }
 0xc18   :  { %v1190_v36 = vadd.f32 %v1189_v35, %v1116_v31 }
 0xc19   :  { %v1199_v38 = vmax.f32 %v1195_v46, 0.0 }
 0xc1a   :  { %v1198_v37 = vmax.f32 %v1190_v36, 0.0 }
 0xc1c   :  { %2977 = vmatprep.mubr.msk.f32.mxu0 %vm1216_vm5, %v1198_v37 }
 0xc1d   :  { %2978 = vmatmul.mubr.msk.f32.vlgmr.msra.gmra.mrb[10].mxu0 %vm1216_vm5, %v1199_v38 }
 0xcf0   :  { %v2979_v41 = vpop.f32.mrb[10].mxu0 }
 0xcf1   :  { %v1303_v42 = vadd.f32 %v2979_v41, %v1203_v40  ;;  %v1297_v43 = vpop.f32.mrb[11].mxu0 }
 0xcf2   :  { %v1298_v44 = vadd.f32 %v1297_v43, %v1203_v40 }
 0xcf3   :  { %v1307_v45 = vadd.f32 %v1303_v42, %v1112_v29  ;;  %v3831_v29 = vld [vmem:[%s4061_s3 + $0x8] sm:$0xff] }
 0xcf4   :  { %v1306_v50 = vadd.f32 %v1298_v44, %v1111_v20  ;;  %v1360_v12 = vrot.slane %v3831_v29, %v35_v11 }
 0xcf5   :  { %v1311_v51 = vsel %vm37_vm0, %v1307_v45, 0.0 }
 0xcf6   :  { %1312 = vadd.xlane.f32.xlu0 %v1311_v51  ;;  %v1308_v52 = vsel %vm37_vm0, %v1306_v50, 0.0 }
 0xcf7   :  { %1309 = vadd.xlane.f32.xlu1 %v1308_v52 }
 0xd83   :  { %v1313_v53 = vpop.xlane.xlu0 %1312 }
 0xd84   :  { %v1315_v54 = vmul.f32 0.03125, %v1313_v53  ;;  %v1310_v8 = vpop.xlane.xlu1 %1309 }
 0xd85   :  { %v1314_v6 = vmul.f32 0.03125, %v1310_v8 }
 0xd86   :  { %v1317_v55 = vsub.f32 %v1307_v45, %v1315_v54 }
 0xd87   :  { %v1316_v56 = vsub.f32 %v1306_v50, %v1314_v6 }
 0xd88   :  { %v1319_v0 = vmul.f32 %v1317_v55, %v1317_v55 }
 0xd89   :  { %v1318_v1 = vmul.f32 %v1316_v56, %v1316_v56 }
 0xd8a   :  { %v1323_v2 = vsel %vm37_vm0, %v1319_v0, 0.0 }
 0xd8b   :  { %1324 = vadd.xlane.f32.xlu0 %v1323_v2  ;;  %v1320_v3 = vsel %vm37_vm0, %v1318_v1, 0.0 }
 0xd8c   :  { %1321 = vadd.xlane.f32.xlu1 %v1320_v3 }
 0xe18   :  { %v1325_v60 = vpop.xlane.xlu0 %1324 }
 0xe19   :  { %v1327_v62 = vmul.f32 0.03125, %v1325_v60  ;;  %v1322_v63 = vpop.xlane.xlu1 %1321 }
 0xe1a   :  { %v1326_v4 = vmul.f32 0.03125, %v1322_v63 }
 0xe1b   :  { %v1329_v7 = vadd.f32 1e-05, %v1327_v62 }
 0xe1c   :  { %v1328_v9 = vadd.f32 1e-05, %v1326_v4 }
 0xe1d   :  { %3405 = vrsqrt.f32 %v1329_v7 }
 0xe1e   :  { %3407 = vrsqrt.f32 %v1328_v9 }
 0xe27   :  { %v3406_v17 = vpop.eup %3405 }
 0xe28   :  { %v3408_v21 = vpop.eup %3407  ;;  %v1333_v23 = vmul.f32 %v3406_v17, %v1317_v55 }
 0xe29   :  { %v1332_v25 = vmul.f32 %v3408_v21, %v1316_v56 }
 0xe2a   :  { %v1339_v26 = vmul.f32 %v1337_v16, %v1333_v23 }
 0xe2b   :  { %v1338_v27 = vmul.f32 %v1337_v16, %v1332_v25 }
 0xe2c   :  { %v3822_v28 = vadd.f32 %v1343_v19, %v1339_v26 }
 0xe2d   :  { %v3820_v20 = vadd.f32 %v1343_v19, %v1338_v27 }
 0xe2f   :  { %2988 = vmatprep.mubr.msk.f32.mxu1 %vm37_vm0, %v3820_v20 }
 0xe30   :  { %2989 = vmatmul.mubr.msk.f32.vlgmr.msra.gmra.mrb[12].mxu1 %vm37_vm0, %v3822_v28 }
 0xf03   :  { %v2990_v31 = vpop.f32.mrb[12].mxu1 }
 0xf04   :  { %v1439_v47 = vadd.f32 %v2990_v31, %v1360_v12  ;;  %v1433_v46 = vpop.f32.mrb[13].mxu1 }
 0xf05   :  { %v1434_v35 = vadd.f32 %v1433_v46, %v1360_v12 }
 0xf06   :  { %v3848_v11 = vmul.f32 0.35355338, %v1439_v47 }
 0xf07   :  { %v3836_v36 = vpack.i.bf16 %v1439_v47, %v1434_v35  ;;  %v3838_v37 = vmul.f32 0.35355338, %v1434_v35 }
 0xf09   :  { %3315 = vrot.lane.b32.xlu0 %v3836_v36, %s3477_s8  ;;  %3310 = vrot.lane.b32.xlu1 %v3836_v36, %s3475_s0 }
 0xf0a   :  { %2995 = vmatprep.mubr.msk.f32.mxu1 %vm127_vm1, %v3838_v37 }
 0xf0d   :  { %1646 = vrot.lane.b32.xlu1 %v3838_v37, %s3476_s7 }
 0xf11   :  { %1648 = vrot.lane.b32.xlu1 %v3848_v11, %s3476_s7 }
 0xf7b   :  { %v3316_v38 = vpop.permute.xlu0 %3315  ;;  %v3311_v40 = vpop.permute.xlu1 %3310 }
 0xf7c   :  { %v3318_v41 = vunpack.i.h.bf16 %v3316_v38  ;;  %v3317_v42 = vunpack.i.l.bf16 %v3316_v38  ;;  %v3313_v43 = vunpack.i.h.bf16 %v3311_v40  ;;  %v3312_v44 = vunpack.i.l.bf16 %v3311_v40 }
 0xf7e   :  { %v3164_v45 = vpack.c.bf16 %v3313_v43, %v3312_v44  ;;  %v3174_v50 = vpack.c.bf16 %v3318_v41, %v3317_v42 }
 0xf7f   :  { %v1647_v51 = vpop.permute.xlu1 %1646 }
 0xf80   :  { %3166 = vmatprep.subr.msk.bf16.mxu1 %vm3591_vm2, %v3164_v45 }
 0xf81   :  { %3169 = vmatpush3.bf16.xpose.msk.msra.mxu1 %vm3591_vm2, %v3164_v45 }
 0xf82   :  { %3176 = vmatprep.subr.msk.bf16.mxu1 %vm3591_vm2, %v3174_v50 }
 0xf83   :  { %v1649_v52 = vpop.permute.xlu1 %1648 }
 0xf88   :  { %2996 = vmatmul.mubr.msk.f32.vlgmr.msra.gmra.mrb[14].mxu1 %vm127_vm1, %v3848_v11 }
 0xf89   :  { %3179 = vmatpush3.bf16.xpose.msk.msra.mxu1 %vm3591_vm2, %v3174_v50  ;;  %3009 = vmatprep.mubr.msk.f32.mxu1 %vm127_vm1, %v1647_v51 }
 0xf90   :  { %3010 = vmatmul.mubr.msk.f32.vlgmr.msra.gmra.mrb[16].mxu1 %vm127_vm1, %v1649_v52 }
0x105b   :  { %v2997_v53 = vpop.f32.mrb[14].mxu1 }
0x105c   :  { %v1532_v54 = vadd.f32 %v2997_v53, %v3610_v32  ;;  %v1526_v8 = vpop.f32.mrb[15].mxu1 }
0x105d   :  { %v1527_v6 = vadd.f32 %v1526_v8, %v3615_v33 }
0x105e   :  { %v1538_v55 = vsel %vm213_vm3, %v1532_v54, -inf }
0x105f   :  { %1539 = vmax.xlane.f32.xlu1 %v1538_v55  ;;  %v1535_v56 = vsel %vm213_vm3, %v1527_v6, -inf }
0x1060   :  { %1536 = vmax.xlane.f32.xlu0 %v1535_v56 }
0x1063   :  { %v3011_v0 = vpop.f32.mrb[16].mxu1 }
0x1064   :  { %v1728_v1 = vpop.f32.mrb[17].mxu1  ;;  %v1734_v3 = vadd.f32 %v3011_v0, %v3610_v32 }
0x1065   :  { %v1729_v2 = vadd.f32 %v1728_v1, %v3615_v33 }
0x1066   :  { %v1740_v48 = vsel %vm213_vm3, %v1734_v3, -inf }
0x1067   :  { %v1737_v57 = vsel %vm213_vm3, %v1729_v2, -inf }
0x1068   :  { %1738 = vmax.xlane.f32.xlu0 %v1737_v57 }
0x106c   :  { %1741 = vmax.xlane.f32.xlu0 %v1740_v48 }
0x1070   :  { %3320 = vrot.lane.b32.xlu1 %v3836_v36, %s3478_s13 }
0x10ec   :  { %v1540_v60 = vpop.xlane.xlu1 %1539 }
0x10ed   :  { %v1542_v62 = vsub.f32 %v1532_v54, %v1540_v60  ;;  %v1537_v63 = vpop.xlane.xlu0 %1536 }
0x10ee   :  { %v1541_v4 = vsub.f32 %v1527_v6, %v1537_v63 }
0x10ef   :  { %v1545_v7 = vmul.f32 1.442695, %v1542_v62 }
0x10f0   :  { %v1543_v9 = vmul.f32 1.442695, %v1541_v4  ;;  %v3321_v16 = vpop.permute.xlu1 %3320 }
0x10f1   :  { %3409 = vpow2.f32 %v1545_v7  ;;  %v3323_v33 = vunpack.i.h.bf16 %v3321_v16  ;;  %v3322_v17 = vunpack.i.l.bf16 %v3321_v16 }
0x10f2   :  { %3411 = vpow2.f32 %v1543_v9 }
0x10f3   :  { %v3170_v32 = vpack.c.bf16 %v3323_v33, %v3322_v17 }
0x10f5   :  { %3171 = vmatprep.subr.bf16.mxu0 %v3170_v32  ;;  %v1739_v21 = vpop.xlane.xlu0 %1738 }
0x10f6   :  { %3173 = vmatpush3.bf16.msra.mxu0 %v3170_v32  ;;  %v1743_v35 = vsub.f32 %v1729_v2, %v1739_v21  ;;  %v3449_v21 = vld [vmem:[%s4059_s1 + $0x8] sm:$0xff] }
0x10f8   :  { %v1745_v38 = vmul.f32 1.442695, %v1743_v35 }
0x10f9   :  { %v1742_v23 = vpop.xlane.xlu0 %1741 }
0x10fa   :  { %v1744_v25 = vsub.f32 %v1734_v3, %v1742_v23 }
0x10fb   :  { %v3410_v19 = vpop.eup %3409 }
0x10fc   :  { %v3412_v26 = vpop.eup %3411  ;;  %v1747_v27 = vmul.f32 1.442695, %v1744_v25  ;;  %v1550_v12 = vsel %vm213_vm3, %v3410_v19, 0.0 }
0x10fd   :  { %1551 = vadd.xlane.f32.xlu0 %v1550_v12  ;;  %v1547_v31 = vsel %vm213_vm3, %v3412_v26, 0.0 }
0x10fe   :  { %3413 = vpow2.f32 %v1747_v27  ;;  %1548 = vadd.xlane.f32.xlu1 %v1547_v31 }
0x10ff   :  { %3415 = vpow2.f32 %v1745_v38 }
0x1108   :  { %v3414_v47 = vpop.eup %3413 }
0x1109   :  { %v1752_v46 = vsel %vm213_vm3, %v3414_v47, 0.0  ;;  %v3416_v40 = vpop.eup %3415 }
0x110a   :  { %1753 = vadd.xlane.f32.xlu0 %v1752_v46  ;;  %v1749_v41 = vsel %vm213_vm3, %v3416_v40, 0.0 }
0x110f   :  { %3330 = vrot.lane.b32.xlu1 %v3836_v36, %s3479_s14 }
0x1120   :  { %3325 = vrot.lane.b32.xlu0 %v3836_v36, %s3480_s15 }
0x1124   :  { %1850 = vrot.lane.b32.xlu0 %v3848_v11, %s3481_s16 }
0x1133   :  { %1750 = vadd.xlane.f32.xlu1 %v1749_v41 }
0x1144   :  { %1848 = vrot.lane.b32.xlu1 %v3838_v37, %s3481_s16 }
0x118a   :  { %v1552_v42 = vpop.xlane.xlu0 %1551 }
0x118b   :  { %3417 = vrcp.f32 %v1552_v42  ;;  %v1549_v43 = vpop.xlane.xlu1 %1548 }
0x118c   :  { %3419 = vrcp.f32 %v1549_v43 }
0x118f   :  { %v3331_v53 = vpop.permute.xlu1 %3330 }
0x1190   :  { %v3333_v8 = vunpack.i.h.bf16 %v3331_v53  ;;  %v3332_v6 = vunpack.i.l.bf16 %v3331_v53 }
0x1192   :  { %v3184_v1 = vpack.c.bf16 %v3333_v8, %v3332_v6 }
0x1195   :  { %v3418_v44 = vpop.eup %3417 }
0x1196   :  { %v3420_v45 = vpop.eup %3419  ;;  %v1556_v52 = vmul.f32 %v3418_v44, %v3410_v19  ;;  %v3450_v19 = vld [vmem:[%s4059_s1] sm:$0xff] }
0x1197   :  { %v1754_v50 = vpop.xlane.xlu0 %1753  ;;  %v1555_v51 = vmul.f32 %v3420_v45, %v3412_v26 }
0x1198   :  { %3421 = vrcp.f32 %v1754_v50 }
0x1199   :  { %3002 = vmatprep.mubr.msk.f32.mxu0 %vm213_vm3, %v1555_v51 }
0x119a   :  { %3003 = vmatmul.mubr.msk.f32.vlgmr.msra.gmra.mrb[12].mxu0 %vm213_vm3, %v1556_v52 }
0x119b   :  { %v3326_v54 = vpop.permute.xlu0 %3325 }
0x119c   :  { %v3328_v55 = vunpack.i.h.bf16 %v3326_v54  ;;  %v3327_v56 = vunpack.i.l.bf16 %v3326_v54 }
0x119e   :  { %v3180_v0 = vpack.c.bf16 %v3328_v55, %v3327_v56 }
0x119f   :  { %v1851_v7 = vpop.permute.xlu0 %1850 }
0x11a0   :  { %3181 = vmatprep.subr.bf16.mxu0 %v3180_v0 }
0x11a1   :  { %3183 = vmatpush3.bf16.msra.mxu0 %v3180_v0 }
0x11a2   :  { %v3422_v2 = vpop.eup %3421  ;;  %3186 = vmatprep.subr.msk.bf16.mxu0 %vm3591_vm2, %v3184_v1 }
0x11a3   :  { %v1758_v3 = vmul.f32 %v3422_v2, %v3414_v47 }
0x11a5   :  { %v3890_v57 = vadd.f32 %v1758_v3, %v1556_v52 }
0x11c0   :  { %v1751_v48 = vpop.xlane.xlu1 %1750 }
0x11c1   :  { %3423 = vrcp.f32 %v1751_v48 }
0x11c4   :  { %v1849_v4 = vpop.permute.xlu1 %1848 }
0x11cb   :  { %v3424_v60 = vpop.eup %3423 }
0x11cc   :  { %v1757_v62 = vmul.f32 %v3424_v60, %v3416_v40 }
0x11ce   :  { %v1759_v63 = vadd.f32 %v1757_v62, %v1555_v51  ;;  %3016 = vmatprep.mubr.msk.f32.mxu0 %vm213_vm3, %v1757_v62 }
0x11cf   :  { %3017 = vmatmul.mubr.msk.f32.vlgmr.msra.gmra.mrb[14].mxu0 %vm213_vm3, %v1758_v3 }
0x11d0   :  { %3189 = vmatpush3.bf16.xpose.msk.msra.mxu0 %vm3591_vm2, %v3184_v1  ;;  %3023 = vmatprep.mubr.msk.f32.mxu0 %vm127_vm1, %v1849_v4 }
0x11d7   :  { %3024 = vmatmul.mubr.msk.f32.vlgmr.msra.gmra.mrb[16].mxu0 %vm127_vm1, %v1851_v7 }
0x126d   :  { %v3898_v9 = vpop.f32.mrb[12].mxu0 }
0x126e   :  { %v3900_v16 = vpop.f32.mrb[13].mxu0 }
0x12a2   :  { %v3902_v33 = vpop.f32.mrb[14].mxu0 }
0x12a3   :  { %v3904_v17 = vpop.f32.mrb[15].mxu0 }
0x12aa   :  { %v3025_v32 = vpop.f32.mrb[16].mxu0 }
0x12ab   :  { %v1936_v23 = vadd.f32 %v3449_v21, %v3025_v32  ;;  %v1930_v25 = vpop.f32.mrb[17].mxu0 }
0x12ac   :  { %v1931_v26 = vadd.f32 %v3450_v19, %v1930_v25 }
0x12ad   :  { %v1942_v27 = vsel %vm213_vm3, %v1936_v23, -inf }
0x12ae   :  { %1943 = vmax.xlane.f32.xlu0 %v1942_v27  ;;  %v1939_v12 = vsel %vm213_vm3, %v1931_v26, -inf }
0x12af   :  { %1940 = vmax.xlane.f32.xlu1 %v1939_v12 }
0x133b   :  { %v1944_v31 = vpop.xlane.xlu0 %1943 }
0x133c   :  { %v1946_v47 = vsub.f32 %v1936_v23, %v1944_v31  ;;  %v1941_v46 = vpop.xlane.xlu1 %1940 }
0x133d   :  { %v1945_v35 = vsub.f32 %v1931_v26, %v1941_v46 }
0x133e   :  { %v1949_v38 = vmul.f32 1.442695, %v1946_v47 }
0x133f   :  { %v1947_v40 = vmul.f32 1.442695, %v1945_v35 }
0x1340   :  { %3425 = vpow2.f32 %v1949_v38  ;;  %v3349_v38 = vpack.i.bf16 %v3796_v18, %v3791_v5 }
0x1341   :  { %3427 = vpow2.f32 %v1947_v40  ;;  %v3354_v40 = vpack.i.bf16 %v3808_v59, %v3803_v58 }
0x134a   :  { %v3426_v41 = vpop.eup %3425 }
0x134b   :  { %v3428_v42 = vpop.eup %3427  ;;  %v1954_v43 = vsel %vm213_vm3, %v3426_v41, 0.0 }
0x134c   :  { %1955 = vadd.xlane.f32.xlu1 %v1954_v43  ;;  %v1951_v44 = vsel %vm213_vm3, %v3428_v42, 0.0 }
0x134d   :  { %1952 = vadd.xlane.f32.xlu0 %v1951_v44 }
0x135d   :  { %3340 = vrot.lane.b32.xlu1 %v3836_v36, %s3482_s17 }
0x1361   :  { %2050 = vrot.lane.b32.xlu1 %v3838_v37, %s3483_s18 }
0x1363   :  { %3335 = vrot.lane.b32.xlu0 %v3836_v36, %s3484_s19 }
0x1367   :  { %2052 = vrot.lane.b32.xlu0 %v3848_v11, %s3483_s18 }
0x13d9   :  { %v1956_v45 = vpop.xlane.xlu1 %1955 }
0x13da   :  { %3429 = vrcp.f32 %v1956_v45  ;;  %v1953_v50 = vpop.xlane.xlu0 %1952 }
0x13db   :  { %3431 = vrcp.f32 %v1953_v50 }
0x13dd   :  { %v3341_v51 = vpop.permute.xlu1 %3340 }
0x13de   :  { %v3336_v52 = vpop.permute.xlu0 %3335  ;;  %v3343_v53 = vunpack.i.h.bf16 %v3341_v51  ;;  %v3342_v54 = vunpack.i.l.bf16 %v3341_v51 }
0x13df   :  { %v3338_v8 = vunpack.i.h.bf16 %v3336_v52  ;;  %v3337_v6 = vunpack.i.l.bf16 %v3336_v52 }
0x13e0   :  { %v3194_v56 = vpack.c.bf16 %v3343_v53, %v3342_v54 }
0x13e1   :  { %v3190_v55 = vpack.c.bf16 %v3338_v8, %v3337_v6  ;;  %v2051_v48 = vpop.permute.xlu1 %2050 }
0x13e2   :  { %v2053_v60 = vpop.permute.xlu0 %2052 }
0x13e3   :  { %3191 = vmatprep.subr.bf16.mxu1 %v3190_v55 }
0x13e4   :  { %v3430_v37 = vpop.eup %3429  ;;  %3193 = vmatpush3.bf16.msra.mxu1 %v3190_v55 }
0x13e5   :  { %v3432_v0 = vpop.eup %3431  ;;  %v1960_v1 = vmul.f32 %v3430_v37, %v3426_v41  ;;  %3196 = vmatprep.subr.msk.bf16.mxu1 %vm3591_vm2, %v3194_v56 }
0x13e6   :  { %v1959_v11 = vmul.f32 %v3432_v0, %v3428_v42 }
0x13e7   :  { %v3927_v2 = vadd.f32 %v1960_v1, %v3890_v57 }
0x13e8   :  { %v3929_v3 = vadd.f32 %v1959_v11, %v1759_v63  ;;  %3030 = vmatprep.mubr.msk.f32.mxu1 %vm213_vm3, %v1959_v11 }
0x13e9   :  { %3031 = vmatmul.mubr.msk.f32.vlgmr.msra.gmra.mrb[18].mxu1 %vm213_vm3, %v1960_v1 }
0x13ea   :  { %3037 = vmatprep.mubr.msk.f32.mxu1 %vm127_vm1, %v2051_v48 }
0x13ed   :  { %3199 = vmatpush3.bf16.xpose.msk.msra.mxu1 %vm3591_vm2, %v3194_v56 }
0x13f4   :  { %3038 = vmatmul.mubr.msk.f32.vlgmr.msra.gmra.mrb[20].mxu1 %vm127_vm1, %v2053_v60 }
0x14bc   :  { %v3032_v62 = vpop.f32.mrb[18].mxu1 }
0x14bd   :  { %v2041_v4 = vpop.f32.mrb[19].mxu1 }
0x14c7   :  { %v3039_v7 = vpop.f32.mrb[20].mxu1 }
0x14c8   :  { %v2138_v57 = vadd.f32 %v3449_v21, %v3039_v7  ;;  %v2132_v32 = vpop.f32.mrb[21].mxu1 }
0x14c9   :  { %v2133_v63 = vadd.f32 %v3450_v19, %v2132_v32 }
0x14ca   :  { %v2144_v23 = vsel %vm213_vm3, %v2138_v57, -inf }
0x14cb   :  { %2145 = vmax.xlane.f32.xlu0 %v2144_v23  ;;  %v2141_v25 = vsel %vm213_vm3, %v2133_v63, -inf }
0x14cc   :  { %2142 = vmax.xlane.f32.xlu1 %v2141_v25 }
0x1558   :  { %v2146_v26 = vpop.xlane.xlu0 %2145 }
0x1559   :  { %v2148_v27 = vsub.f32 %v2138_v57, %v2146_v26  ;;  %v2143_v12 = vpop.xlane.xlu1 %2142 }
0x155a   :  { %v2147_v24 = vsub.f32 %v2133_v63, %v2143_v12 }
0x155b   :  { %v2151_v31 = vmul.f32 1.442695, %v2148_v27 }
0x155c   :  { %v2149_v47 = vmul.f32 1.442695, %v2147_v24 }
0x155d   :  { %3433 = vpow2.f32 %v2151_v31 }
0x155e   :  { %3435 = vpow2.f32 %v2149_v47 }
0x1567   :  { %v3434_v46 = vpop.eup %3433 }
0x1568   :  { %v3436_v35 = vpop.eup %3435  ;;  %v2156_v21 = vsel %vm213_vm3, %v3434_v46, 0.0 }
0x1569   :  { %2157 = vadd.xlane.f32.xlu1 %v2156_v21  ;;  %v2153_v19 = vsel %vm213_vm3, %v3436_v35, 0.0 }
0x156a   :  { %2154 = vadd.xlane.f32.xlu0 %v2153_v19 }
0x157a   :  { %3350 = vrot.lane.b32.xlu1 %v3349_v38, %s3485_s20 }
0x157e   :  { %3355 = vrot.lane.b32.xlu1 %v3354_v40, %s3485_s20 }
0x1580   :  { %3345 = vrot.lane.b32.xlu0 %v3836_v36, %s3486_s21 }
0x1582   :  { %2266 = vrot.lane.b32.xlu1 %v3902_v33, %s3487_s22 }
0x1584   :  { %2264 = vrot.lane.b32.xlu0 %v3904_v17, %s3487_s22 }
0x1586   :  { %2274 = vrot.lane.b32.xlu1 %v3032_v62, %s3488_s23 }
0x1588   :  { %2272 = vrot.lane.b32.xlu0 %v2041_v4, %s3488_s23 }
0x15f6   :  { %v2158_v5 = vpop.xlane.xlu1 %2157 }
0x15f7   :  { %3437 = vrcp.f32 %v2158_v5  ;;  %v2155_v18 = vpop.xlane.xlu0 %2154 }
0x15f8   :  { %3439 = vrcp.f32 %v2155_v18  ;;  %v2728_v18 = vld [vmem:[%s4060_s2 + $0x58] sm:$0xff] }
0x15fa   :  { %v3351_v58 = vpop.permute.xlu1 %3350 }
0x15fb   :  { %v3353_v59 = vunpack.i.h.bf16 %v3351_v58  ;;  %v3352_v41 = vunpack.i.l.bf16 %v3351_v58  ;;  %v3346_v42 = vpop.permute.xlu0 %3345 }
0x15fc   :  { %v3348_v43 = vunpack.i.h.bf16 %v3346_v42  ;;  %v3347_v36 = vunpack.i.l.bf16 %v3346_v42 }
0x15fd   :  { %v3204_v44 = vpack.c.bf16 %v3353_v59, %v3352_v41  ;;  %v2729_v59 = vld [vmem:[%s4060_s2 + $0x68] sm:$0xff]  ;;  %v2730_v41 = vld [vmem:[%s4060_s2 + $0x78] sm:$0xff] }
0x15fe   :  { %v3200_v45 = vpack.c.bf16 %v3348_v43, %v3347_v36  ;;  %v3356_v33 = vpop.permute.xlu1 %3355  ;;  %v3216_v42 = vpack.c.bf16 %v2730_v41, %v2729_v59  ;;  %v3364_v36 = vpack.i.bf16 %v2730_v41, %v2729_v59 }
0x15ff   :  { %v3358_v50 = vunpack.i.h.bf16 %v3356_v33  ;;  %v3357_v51 = vunpack.i.l.bf16 %v3356_v33  ;;  %v2265_v11 = vpop.permute.xlu0 %2264 }
0x1600   :  { %3201 = vmatprep.subr.bf16.mxu0 %v3200_v45  ;;  %v2286_v48 = vsel %vm127_vm1, %v3900_v16, %v2265_v11  ;;  %v2295_v16 = vrot.slane %v3831_v29, %v973_v34  ;;  %v2430_v11 = vrot.slane %v3831_v29, %v1109_v49  ;;  %v2436_v49 = vrot.slane %v3831_v29, %v1115_v30 }
0x1601   :  { %v3438_v17 = vpop.eup %3437  ;;  %3203 = vmatpush3.bf16.msra.mxu0 %v3200_v45  ;;  %v3208_v8 = vpack.c.bf16 %v3358_v50, %v3357_v51 }
0x1602   :  { %v3440_v52 = vpop.eup %3439  ;;  %v2162_v53 = vmul.f32 %v3438_v17, %v3434_v46  ;;  %3205 = vmatprep.subr.bf16.mxu0 %v3204_v44  ;;  %v2267_v1 = vpop.permute.xlu1 %2266 }
0x1603   :  { %v2161_v54 = vmul.f32 %v3440_v52, %v3436_v35  ;;  %v2287_v62 = vsel %vm127_vm1, %v3898_v9, %v2267_v1  ;;  %v2424_v52 = vrot.slane %v3831_v29, %v1103_v61 }
0x1604   :  { %v3956_v6 = vadd.f32 %v2162_v53, %v3927_v2 }
0x1605   :  { %v2163_v55 = vadd.f32 %v2161_v54, %v3929_v3  ;;  %3044 = vmatprep.mubr.msk.f32.mxu0 %vm213_vm3, %v2161_v54  ;;  %v2273_v3 = vpop.permute.xlu0 %2272 }
0x1606   :  { %3045 = vmatmul.mubr.msk.f32.vlgmr.msra.gmra.mrb[18].mxu0 %vm213_vm3, %v2162_v53  ;;  %v2275_v2 = vpop.permute.xlu1 %2274  ;;  %v2288_v4 = vsel %vm213_vm3, %v2286_v48, %v2273_v3 }
0x1607   :  { %v2252_v56 = vmul.f32 0.25, %v2163_v55  ;;  %3207 = vmatpush3.bf16.msra.mxu0 %v3204_v44  ;;  %v2289_v57 = vsel %vm213_vm3, %v2287_v62, %v2275_v2 }
0x1608   :  { %3209 = vmatprep.subr.bf16.mxu0 %v3208_v8 }
0x1609   :  { %2255 = vst.msk [vmem:[#allocation2 + $0x10] sm:$0xff] %vm127_vm1, %v2252_v56 }
0x160b   :  { %3211 = vmatpush3.bf16.msra.mxu0 %v3208_v8 }
0x16d9   :  { %v3046_v37 = vpop.f32.mrb[18].mxu0 }
0x16da   :  { %2282 = vrot.lane.b32.xlu1 %v3046_v37, %s3489_s24  ;;  %v2243_v0 = vpop.f32.mrb[19].mxu0 }
0x16db   :  { %2280 = vrot.lane.b32.xlu0 %v2243_v0, %s3489_s24 }
0x174c   :  { %v2283_v60 = vpop.permute.xlu1 %2282 }
0x174d   :  { %v2281_v7 = vpop.permute.xlu0 %2280  ;;  %v2291_v63 = vsel %vm968_vm4, %v2289_v57, %v2283_v60 }
0x174e   :  { %v2290_v32 = vsel %vm968_vm4, %v2288_v4, %v2281_v7 }
0x174f   :  { %3055 = vmatprep.mubr.msk.f32.mxu0 %vm37_vm0, %v2290_v32 }
0x1750   :  { %3056 = vmatmul.mubr.msk.f32.vlgmr.msra.gmra.mrb[20].mxu0 %vm37_vm0, %v2291_v63 }
0x1823   :  { %v3057_v23 = vpop.f32.mrb[20].mxu0 }
0x1824   :  { %v2390_v25 = vadd.f32 %v3057_v23, %v2295_v16  ;;  %v2384_v9 = vpop.f32.mrb[21].mxu0 }
0x1825   :  { %v2385_v26 = vadd.f32 %v2384_v9, %v2295_v16  ;;  %v2523_v9 = vrot.slane %v3831_v29, %v1202_v39 }
0x1826   :  { %v2394_v27 = vadd.f32 %v2390_v25, %v3822_v28 }
0x1827   :  { %v2393_v12 = vadd.f32 %v2385_v26, %v3820_v20  ;;  %v2727_v20 = vld [vmem:[%s4060_s2 + $0x48] sm:$0xff]  ;;  %s3490_s2 = smov [#allocation2]  }
0x1828   :  { %v2398_v24 = vsel %vm37_vm0, %v2394_v27, 0.0  ;;  %v3212_v58 = vpack.c.bf16 %v2728_v18, %v2727_v20  ;;  %v3359_v43 = vpack.i.bf16 %v2728_v18, %v2727_v20  ;;  %v932_v20 = vmul.f32 0.25, %v3708_v13 }
0x1829   :  { %2399 = vadd.xlane.f32.xlu1 %v2398_v24  ;;  %v2395_v31 = vsel %vm37_vm0, %v2393_v12, 0.0  ;;  %v2253_v18 = vmul.f32 0.25, %v3956_v6 }
0x182a   :  { %2396 = vadd.xlane.f32.xlu0 %v2395_v31  ;;  %3213 = vmatprep.subr.bf16.mxu1 %v3212_v58 }
0x182b   :  { %3215 = vmatpush3.bf16.msra.mxu1 %v3212_v58 }
0x182c   :  { %3217 = vmatprep.subr.bf16.mxu1 %v3216_v42 }
0x182f   :  { %3219 = vmatpush3.bf16.msra.mxu1 %v3216_v42 }
0x183a   :  { %3360 = vrot.lane.b32.xlu1 %v3359_v43, %s3478_s13 }
0x18b6   :  { %v2400_v47 = vpop.xlane.xlu1 %2399 }
0x18b7   :  { %v2402_v46 = vmul.f32 0.03125, %v2400_v47  ;;  %v2397_v35 = vpop.xlane.xlu0 %2396 }
0x18b8   :  { %v2401_v21 = vmul.f32 0.03125, %v2397_v35 }
0x18b9   :  { %v2404_v19 = vsub.f32 %v2394_v27, %v2402_v46 }
0x18ba   :  { %v2403_v34 = vsub.f32 %v2393_v12, %v2401_v21  ;;  %v3361_v53 = vpop.permute.xlu1 %3360 }
0x18bb   :  { %v2406_v5 = vmul.f32 %v2404_v19, %v2404_v19  ;;  %v3363_v55 = vunpack.i.h.bf16 %v3361_v53  ;;  %v3362_v56 = vunpack.i.l.bf16 %v3361_v53 }
0x18bc   :  { %v2405_v38 = vmul.f32 %v2403_v34, %v2403_v34 }
0x18bd   :  { %v2410_v28 = vsel %vm37_vm0, %v2406_v5, 0.0  ;;  %v3220_v2 = vpack.c.bf16 %v3363_v55, %v3362_v56 }
0x18be   :  { %v2407_v40 = vsel %vm37_vm0, %v2405_v38, 0.0 }
0x18bf   :  { %2408 = vadd.xlane.f32.xlu0 %v2407_v40  ;;  %3222 = vmatprep.subr.msk.bf16.mxu0 %vm3760_vm6, %v3220_v2 }
0x18c0   :  { %3225 = vmatpush3.bf16.xpose.msk.msra.mxu0 %vm3760_vm6, %v3220_v2 }
0x18c3   :  { %2411 = vadd.xlane.f32.xlu0 %v2410_v28 }
0x18d9   :  { %3365 = vrot.lane.b32.xlu0 %v3364_v36, %s3478_s13  ;;  %s2674_s13 = sshll.u32 %s3490_s2, 4  ;;  %s2675_s13 = int_to_ptr.vmem [resolvable:$true] %s2674_s13 }
0x18da   :  { %s3451_s23 = scalar_lea.vmem %s2675_s13, 512  ;;  %p3456_p1 = scmp.lt.s32.totalorder %s2675_s13, %s2675_s13 }
0x18db   :  { %p3452_p0 = scmp.ne.s32.totalorder %s2675_s13, %s3451_s23  ;;  %p3457_p2 = scmp.lt.s32.totalorder %s3451_s23, %s3451_s23 }
0x18dd   :  { %p3458_p3 = por %p3457_p2, %p3456_p1 }
0x18df   :  { %p3459_p4 = pnand %p3458_p3, %p3452_p0 }
0x194c   :  { %v2409_v44 = vpop.xlane.xlu0 %2408 }
0x194d   :  { %v2413_v45 = vmul.f32 0.03125, %v2409_v44 }
0x194f   :  { %v2415_v33 = vadd.f32 1e-05, %v2413_v45 }
0x1950   :  { %v2412_v50 = vpop.xlane.xlu0 %2411 }
0x1951   :  { %3441 = vrsqrt.f32 %v2415_v33  ;;  %v2414_v51 = vmul.f32 0.03125, %v2412_v50 }
0x1953   :  { %v2416_v17 = vadd.f32 1e-05, %v2414_v51 }
0x1954   :  { %v3366_v54 = vpop.permute.xlu0 %3365 }
0x1955   :  { %3443 = vrsqrt.f32 %v2416_v17  ;;  %v3368_v37 = vunpack.i.h.bf16 %v3366_v54  ;;  %v3367_v0 = vunpack.i.l.bf16 %v3366_v54 }
0x1957   :  { %v3226_v3 = vpack.c.bf16 %v3368_v37, %v3367_v0 }
0x1959   :  { %3228 = vmatprep.subr.msk.bf16.mxu0 %vm3760_vm6, %v3226_v3 }
0x195a   :  { %3231 = vmatpush3.bf16.xpose.msk.msra.mxu0 %vm3760_vm6, %v3226_v3 }
0x195b   :  { %v3442_v8 = vpop.eup %3441 }
0x195c   :  { %v2419_v1 = vmul.f32 %v3442_v8, %v2403_v34 }
0x195e   :  { %v2425_v48 = vmul.f32 %v2424_v52, %v2419_v1 }
0x195f   :  { %v3444_v60 = vpop.eup %3443 }
0x1960   :  { %v2420_v61 = vmul.f32 %v3444_v60, %v2404_v19  ;;  %v2431_v62 = vadd.f32 %v2430_v11, %v2425_v48 }
0x1962   :  { %v2426_v4 = vmul.f32 %v2424_v52, %v2420_v61  ;;  %3066 = vmatprep.mubr.msk.f32.mxu1 %vm37_vm0, %v2431_v62 }
0x1964   :  { %v2432_v7 = vadd.f32 %v2430_v11, %v2426_v4 }
0x1966   :  { %3067 = vmatmul.mubr.msk.f32.vlgmr.msra.gmra.mrb[22].mxu1 %vm37_vm0, %v2432_v7 }
0x1a39   :  { %v3068_v57 = vpop.f32.mrb[22].mxu1 }
0x1a3a   :  { %v2515_v32 = vadd.f32 %v3068_v57, %v2436_v49  ;;  %v2509_v63 = vpop.f32.mrb[23].mxu1 }
0x1a3b   :  { %v2510_v16 = vadd.f32 %v2509_v63, %v2436_v49 }
0x1a3c   :  { %v2519_v25 = vmax.f32 %v2515_v32, 0.0 }
0x1a3d   :  { %v2518_v23 = vmax.f32 %v2510_v16, 0.0 }
0x1a3f   :  { %3077 = vmatprep.mubr.msk.f32.mxu0 %vm1216_vm5, %v2518_v23 }
0x1a40   :  { %3078 = vmatmul.mubr.msk.f32.vlgmr.msra.gmra.mrb[22].mxu0 %vm1216_vm5, %v2519_v25 }
0x1b13   :  { %v3079_v22 = vpop.f32.mrb[22].mxu0 }
0x1b14   :  { %v2622_v26 = vadd.f32 %v3079_v22, %v2523_v9  ;;  %v2616_v27 = vpop.f32.mrb[23].mxu0 }
0x1b15   :  { %v2617_v12 = vadd.f32 %v2616_v27, %v2523_v9 }
0x1b16   :  { %v2626_v24 = vadd.f32 %v2622_v26, %v2432_v7 }
0x1b17   :  { %v2625_v30 = vadd.f32 %v2617_v12, %v2431_v62 }
0x1b18   :  { %v2630_v31 = vsel %vm37_vm0, %v2626_v24, 0.0 }
0x1b19   :  { %2631 = vadd.xlane.f32.xlu0 %v2630_v31  ;;  %v2627_v47 = vsel %vm37_vm0, %v2625_v30, 0.0 }
0x1b1a   :  { %2628 = vadd.xlane.f32.xlu1 %v2627_v47 }
0x1ba6   :  { %v2632_v46 = vpop.xlane.xlu0 %2631 }
0x1ba7   :  { %v2634_v35 = vmul.f32 0.03125, %v2632_v46  ;;  %v2629_v21 = vpop.xlane.xlu1 %2628 }
0x1ba8   :  { %v2633_v19 = vmul.f32 0.03125, %v2629_v21 }
0x1ba9   :  { %v2636_v34 = vsub.f32 %v2626_v24, %v2634_v35 }
0x1baa   :  { %v2635_v38 = vsub.f32 %v2625_v30, %v2633_v19 }
0x1bab   :  { %v2638_v40 = vmul.f32 %v2636_v34, %v2636_v34 }
0x1bac   :  { %v2637_v39 = vmul.f32 %v2635_v38, %v2635_v38 }
0x1bad   :  { %v2642_v5 = vsel %vm37_vm0, %v2638_v40, 0.0 }
0x1bae   :  { %2643 = vadd.xlane.f32.xlu0 %v2642_v5  ;;  %v2639_v28 = vsel %vm37_vm0, %v2637_v39, 0.0 }
0x1baf   :  { %2640 = vadd.xlane.f32.xlu1 %v2639_v28 }
0x1bc0   :  { %935 = vrot.lane.b32.xlu1 %v932_v20, %s3476_s7 }
0x1bc4   :  { %2257 = vrot.lane.b32.xlu0 %v2253_v18, %s3476_s7 }
0x1c3b   :  { %v2644_v58 = vpop.xlane.xlu0 %2643 }
0x1c3c   :  { %v2646_v59 = vmul.f32 0.03125, %v2644_v58  ;;  %v2641_v41 = vpop.xlane.xlu1 %2640 }
0x1c3d   :  { %v2645_v42 = vmul.f32 0.03125, %v2641_v41 }
0x1c3e   :  { %v2648_v43 = vadd.f32 1e-05, %v2646_v59 }
0x1c3f   :  { %v2647_v36 = vadd.f32 1e-05, %v2645_v42  ;;  %v2258_v44 = vpop.permute.xlu0 %2257 }
0x1c40   :  { %3445 = vrsqrt.f32 %v2648_v43  ;;  %2261 = vst.msk [vmem:[#allocation2 + $0x18] sm:$0xff] %vm127_vm1, %v2258_v44  ;;  %v936_v13 = vpop.permute.xlu1 %935 }
0x1c41   :  { %3447 = vrsqrt.f32 %v2647_v36  ;;  %939 = vst.msk [vmem:[#allocation2 + $0x8] sm:$0xff] %vm127_vm1, %v936_v13 }
0x1c42   :  { %3462 = shalt.err (!%p3459_p4)
}
0x1c43   :  { %s3463_s9 = scalar_lea.hbm %s4063_s5, 512 }
0x1c44   :  { %p3464_p5 = scmp.ne.s32.totalorder %s4063_s5, %s3463_s9  ;;  %p3467_p6 = scmp.lt.u32.totalorder %s3463_s9, %s4063_s5 }
0x1c46   :  { %p3469_p7 = pnand %p3467_p6, %p3464_p5 }
0x1c48   :  { %3472 = shalt.err (!%p3469_p7)
}
0x1c49   :  { %s3491_s26 = smov 128   ;;  %v2656_v6 = vrot.slane %v3831_v29, %v1336_v14  ;;  %v2662_v50 = vrot.slane %v3831_v29, %v1342_v15 }
0x1c4a   :  { %2680 = dma.vmem_to_hbm [thread:$0]  %s2675_s13, 512, %s4063_s5, [#allocation3], %s3491_s26, %s3491_s26, %s3487_s22   ;;  %v3446_v45 = vpop.eup %3445 }
0x1c4b   :  { %v3448_v33 = vpop.eup %3447  ;;  %v2652_v51 = vmul.f32 %v3446_v45, %v2636_v34 }
0x1c4c   :  { %v2651_v17 = vmul.f32 %v3448_v33, %v2635_v38 }
0x1c4d   :  { %v2658_v52 = vmul.f32 %v2656_v6, %v2652_v51 }
0x1c4e   :  { %v2657_v53 = vmul.f32 %v2656_v6, %v2651_v17 }
0x1c4f   :  { %v2664_v54 = vadd.f32 %v2662_v50, %v2658_v52 }
0x1c50   :  { %v2663_v8 = vadd.f32 %v2662_v50, %v2657_v53 }
0x1c51   :  { %2666 = vst.msk [vmem:[%s4062_s4 + $0x8] sm:$0xff] %vm37_vm0, %v2664_v54 }
0x1c52   :  { %2665 = vst.msk [vmem:[%s4062_s4] sm:$0xff] %vm37_vm0, %v2663_v8 }
0x1c53   :  { %3473 = dma.done.wait [#allocation3], 512  }
0x1c54   :  { %3474 = vsyncadd [#allocation3], 4294966784 }
0x1c55   :  { %2686 = vsyncpa [#allocation3], 1 }

</bundles_post_ra>
